<compile_context>
chip_gen: v7x
topology: tpu7x:2x2x1
jax: 0.10.0
libtpu: 0.0.40
codegen_flags: <defaults>
</compile_context>

<pallas_src>
import jax
import jax.numpy as jnp
from jax.experimental import pallas as pl
from jax.experimental.pallas import tpu as pltpu


def _round_up(n, m):
    return ((n + m - 1) // m) * m


def _swish(x, approx):
    if approx:
        # sigmoid(x) = 1 / (1 + exp(-x)); approx reciprocal goes to the EUP slot
        # alongside the exp, leaving VALU slots for the surrounding mul/adds.
        sig = pl.reciprocal(1.0 + jnp.exp(-x), approx=True)
    else:
        sig = jax.nn.sigmoid(x)
    return x * sig


def _make_kernel(n_res, out_pad, approx_swish):
    def kernel(*refs):
        # refs layout:
        #   x, w0, b0, (w_i, b_i) * n_res, w_out_fused, b_out_fused,
        #   min_logvar, max_logvar, mean_out, logvar_out
        it = iter(refs)
        x_ref = next(it)
        w0 = next(it)
        b0 = next(it)
        res = [(next(it), next(it)) for _ in range(n_res)]
        wo = next(it)
        bo = next(it)
        minlv = next(it)
        maxlv = next(it)
        mean_ref = next(it)
        logvar_ref = next(it)

        wd = w0.dtype                       # matmul operand dtype (bf16 or f32)
        x = x_ref[...]

        # input layer: Linear + Swish (f32 accumulation; elementwise stays f32)
        h = jnp.dot(x.astype(wd), w0[...], preferred_element_type=jnp.float32) + b0[...]
        h = _swish(h, approx_swish)

        # residual backbones: h = h + Swish(Linear(h)); dropout = identity at eval
        for w_ref, b_ref in res:
            y = jnp.dot(h.astype(wd), w_ref[...],
                        preferred_element_type=jnp.float32) + b_ref[...]
            h = h + _swish(y, approx_swish)

        # fused output projection: lanes [0, out_pad) = mean, [out_pad, 2*out_pad) = logvar
        z = jnp.dot(h.astype(wd), wo[...], preferred_element_type=jnp.float32) + bo[...]
        mean = z[:, :out_pad]
        logvar = z[:, out_pad:]

        # soft_clamp(logvar, min_logvar, max_logvar) in f32
        hi = maxlv[...]
        lo = minlv[...]
        logvar = hi - jax.nn.softplus(hi - logvar)
        logvar = lo + jax.nn.softplus(logvar - lo)

        mean_ref[...] = mean.astype(mean_ref.dtype)
        logvar_ref[...] = logvar.astype(logvar_ref.dtype)

    return kernel


def vanilla_dynamics_forward(x, params, *, weight_dtype=jnp.bfloat16,
                             approx_swish=True, max_batch_tile=512):
    """Pallas forward. x: (B, input_dim) f32 -> (mean, logvar) each (B, output_dim)."""
    B, in_dim = x.shape
    out_dim = params["w_mean"].shape[1]
    n_res = len(params["res_w"])
    H = params["w0"].shape[1]

    # ---- pad feature dims to lane / MXU friendly sizes ----
    H_pad = _round_up(H, 256)          # 200 -> 256: lane-dense, one MXU tile on v6e/v7x
    out_pad = _round_up(out_dim, 128)  # lane-dense outputs (no masked partial stores)

    def pad2(a, rows, cols):
        return jnp.pad(a, ((0, rows - a.shape[0]), (0, cols - a.shape[1])))

    w0 = pad2(params["w0"], in_dim, H_pad).astype(weight_dtype)
    b0 = pad2(params["b0"], 1, H_pad)
    res_w = [pad2(w, H_pad, H_pad).astype(weight_dtype) for w in params["res_w"]]
    res_b = [pad2(b, 1, H_pad) for b in params["res_b"]]

    # fuse mean/logvar projections into one lane-aligned (H_pad, 2*out_pad) matmul
    w_out = jnp.zeros((H_pad, 2 * out_pad), jnp.float32)
    w_out = w_out.at[:H, :out_dim].set(params["w_mean"])
    w_out = w_out.at[:H, out_pad:out_pad + out_dim].set(params["w_logvar"])
    w_out = w_out.astype(weight_dtype)
    b_out = jnp.zeros((1, 2 * out_pad), jnp.float32)
    b_out = b_out.at[:, :out_dim].set(params["b_mean"])
    b_out = b_out.at[:, out_pad:out_pad + out_dim].set(params["b_logvar"])

    minlv = pad2(params["min_logvar"], 1, out_pad)
    maxlv = pad2(params["max_logvar"], 1, out_pad)

    # ---- batch tiling: one big tile for small B, max_batch_tile-row tiles otherwise ----
    if B <= max_batch_tile:
        tile = _round_up(B, 8)
        B_pad = tile
    else:
        tile = max_batch_tile
        B_pad = _round_up(B, tile)
    if B_pad != B:
        x = jnp.pad(x, ((0, B_pad - B), (0, 0)))

    flat_args = [x, w0, b0]
    for w, b in zip(res_w, res_b):
        flat_args += [w, b]
    flat_args += [w_out, b_out, minlv, maxlv]

    def full_spec(arr):
        # whole-array block, constant index across the batch grid -> not re-DMA'd.
        # (Default double-buffering of these small weights costs ~1 MB VMEM; fine.)
        return pl.BlockSpec(arr.shape, lambda i: (0,) * arr.ndim)

    in_specs = [pl.BlockSpec((tile, in_dim), lambda i: (i, 0))]
    in_specs += [full_spec(a) for a in flat_args[1:]]

    out_specs = [
        pl.BlockSpec((tile, out_pad), lambda i: (i, 0)),
        pl.BlockSpec((tile, out_pad), lambda i: (i, 0)),
    ]
    out_shape = (
        jax.ShapeDtypeStruct((B_pad, out_pad), jnp.float32),
        jax.ShapeDtypeStruct((B_pad, out_pad), jnp.float32),
    )

    kernel = _make_kernel(n_res, out_pad, approx_swish)

    mean_p, logvar_p = pl.pallas_call(
        kernel,
        out_shape=out_shape,
        grid_spec=pltpu.PrefetchScalarGridSpec(
            num_scalar_prefetch=0,
            grid=(B_pad // tile,),
            in_specs=in_specs,
            out_specs=out_specs,
        ),
        compiler_params=pltpu.CompilerParams(
            dimension_semantics=("parallel",),
        ),
    )(*flat_args)

    return mean_p[:B, :out_dim], logvar_p[:B, :out_dim]


def init_params(key, input_dim, output_dim, hidden_dims):
    """Deterministic synthetic parameters (not a checkpoint load)."""
    keys = jax.random.split(key, 16)
    ki = iter(keys)

    def linear(k, d_in, d_out):
        bound = 1.0 / jnp.sqrt(d_in)
        kw, kb = jax.random.split(k)
        w = jax.random.uniform(kw, (d_in, d_out), jnp.float32, -bound, bound)
        b = jax.random.uniform(kb, (1, d_out), jnp.float32, -bound, bound)
        return w, b

    w0, b0 = linear(next(ki), input_dim, hidden_dims[0])
    res_w, res_b = [], []
    for d_in, d_out in zip(hidden_dims[:-1], hidden_dims[1:]):
        w, b = linear(next(ki), d_in, d_out)
        res_w.append(w)
        res_b.append(b)
    # output layer: Linear(hidden[-1], 2*output_dim) split into mean/logvar halves
    w_out, b_out = linear(next(ki), hidden_dims[-1], 2 * output_dim)
    params = dict(
        w0=w0, b0=b0,
        res_w=res_w, res_b=res_b,
        w_mean=w_out[:, :output_dim], b_mean=b_out[:, :output_dim],
        w_logvar=w_out[:, output_dim:], b_logvar=b_out[:, output_dim:],
        max_logvar=jnp.full((1, output_dim), 0.5, jnp.float32),
        min_logvar=jnp.full((1, output_dim), -10.0, jnp.float32),
    )
    return params


def reference_forward(x, params):
    """Pure-JAX f32 reference (mirrors the PyTorch module at eval time)."""
    def swish(v):
        return v * jax.nn.sigmoid(v)
    h = swish(x @ params["w0"] + params["b0"])
    for w, b in zip(params["res_w"], params["res_b"]):
        h = h + swish(h @ w + b)
    mean = h @ params["w_mean"] + params["b_mean"]
    logvar = h @ params["w_logvar"] + params["b_logvar"]
    hi, lo = params["max_logvar"], params["min_logvar"]
    logvar = hi - jax.nn.softplus(hi - logvar)
    logvar = lo + jax.nn.softplus(logvar - lo)
    return mean, logvar


if __name__ == "__main__":
    # small shapes consistent with the module: obs+act features -> (mean, logvar)
    batch = 16
    input_dim = 24      # e.g. obs_dim 18 + act_dim 6
    output_dim = 18
    hidden_dims = [200, 200, 200, 200]

    key = jax.random.PRNGKey(0)
    k_param, k_x = jax.random.split(key)
    params = init_params(k_param, input_dim, output_dim, hidden_dims)
    x = jax.random.normal(k_x, (batch, input_dim), jnp.float32)

    ref_mean, ref_logvar = reference_forward(x, params)

    # 1) exact-precision path (f32 weights, exact sigmoid): tight check vs reference
    mean, logvar = vanilla_dynamics_forward(
        x, params, weight_dtype=jnp.float32, approx_swish=False)
    jax.block_until_ready((mean, logvar))
    assert jnp.allclose(mean, ref_mean, atol=1e-4, rtol=1e-4)
    assert jnp.allclose(logvar, ref_logvar, atol=1e-4, rtol=1e-4)

    # 2) exercise the multi-step (tiled) grid path as well
    mean_t, logvar_t = vanilla_dynamics_forward(
        x, params, weight_dtype=jnp.float32, approx_swish=False, max_batch_tile=8)
    jax.block_until_ready((mean_t, logvar_t))
    assert jnp.allclose(mean_t, ref_mean, atol=1e-4, rtol=1e-4)
    assert jnp.allclose(logvar_t, ref_logvar, atol=1e-4, rtol=1e-4)

    # 3) performance path (default): bf16 matmul operands + approx-recip swish
    mean_p, logvar_p = vanilla_dynamics_forward(x, params)
    jax.block_until_ready((mean_p, logvar_p))
    assert jnp.allclose(mean_p, ref_mean, atol=5e-2, rtol=5e-2)
    assert jnp.allclose(logvar_p, ref_logvar, atol=5e-2, rtol=5e-2)

    print("KERNEL_OK")
</pallas_src>

<mosaic_0001>
module attributes {stable_mosaic.version = 11 : i64} {
  func.func @kernel(%arg0: i32, %arg1: memref<16x24xf32, #tpu.memory_space<vmem>>, %arg2: memref<24x256xf32, #tpu.memory_space<vmem>>, %arg3: memref<1x256xf32, #tpu.memory_space<vmem>>, %arg4: memref<256x256xf32, #tpu.memory_space<vmem>>, %arg5: memref<1x256xf32, #tpu.memory_space<vmem>>, %arg6: memref<256x256xf32, #tpu.memory_space<vmem>>, %arg7: memref<1x256xf32, #tpu.memory_space<vmem>>, %arg8: memref<256x256xf32, #tpu.memory_space<vmem>>, %arg9: memref<1x256xf32, #tpu.memory_space<vmem>>, %arg10: memref<256x256xf32, #tpu.memory_space<vmem>>, %arg11: memref<1x256xf32, #tpu.memory_space<vmem>>, %arg12: memref<1x128xf32, #tpu.memory_space<vmem>>, %arg13: memref<1x128xf32, #tpu.memory_space<vmem>>, %arg14: memref<16x128xf32, #tpu.memory_space<vmem>>, %arg15: memref<16x128xf32, #tpu.memory_space<vmem>>) attributes {dimension_semantics = [#tpu.dimension_semantics<parallel>], iteration_bounds = array<i64: 1>, scalar_prefetch = 0 : i64, scratch_operands = 0 : i64, tpu.core_type = #tpu.core_type<tc>, window_params = [{transform_indices = @transform_0, window_bounds = array<i64: 16, 24>}, {pipeline_mode = #tpu.pipeline_mode<synchronous>, transform_indices = @transform_1, window_bounds = array<i64: 24, 256>}, {pipeline_mode = #tpu.pipeline_mode<synchronous>, transform_indices = @transform_2, window_bounds = array<i64: 1, 256>}, {pipeline_mode = #tpu.pipeline_mode<synchronous>, transform_indices = @transform_3, window_bounds = array<i64: 256, 256>}, {pipeline_mode = #tpu.pipeline_mode<synchronous>, transform_indices = @transform_4, window_bounds = array<i64: 1, 256>}, {pipeline_mode = #tpu.pipeline_mode<synchronous>, transform_indices = @transform_5, window_bounds = array<i64: 256, 256>}, {pipeline_mode = #tpu.pipeline_mode<synchronous>, transform_indices = @transform_6, window_bounds = array<i64: 1, 256>}, {pipeline_mode = #tpu.pipeline_mode<synchronous>, transform_indices = @transform_7, window_bounds = array<i64: 256, 256>}, {pipeline_mode = #tpu.pipeline_mode<synchronous>, transform_indices = @transform_8, window_bounds = array<i64: 1, 256>}, {pipeline_mode = #tpu.pipeline_mode<synchronous>, transform_indices = @transform_9, window_bounds = array<i64: 256, 256>}, {pipeline_mode = #tpu.pipeline_mode<synchronous>, transform_indices = @transform_10, window_bounds = array<i64: 1, 256>}, {pipeline_mode = #tpu.pipeline_mode<synchronous>, transform_indices = @transform_11, window_bounds = array<i64: 1, 128>}, {pipeline_mode = #tpu.pipeline_mode<synchronous>, transform_indices = @transform_12, window_bounds = array<i64: 1, 128>}, {transform_indices = @transform_13, window_bounds = array<i64: 16, 128>}, {transform_indices = @transform_14, window_bounds = array<i64: 16, 128>}]} {
    %c0 = arith.constant 0 : index
    %c0_0 = arith.constant 0 : index
    %0 = vector.load %arg1[%c0, %c0_0] : memref<16x24xf32, #tpu.memory_space<vmem>>, vector<16x24xf32>
    %c0_1 = arith.constant 0 : index
    %c0_2 = arith.constant 0 : index
    %1 = vector.load %arg2[%c0_1, %c0_2] : memref<24x256xf32, #tpu.memory_space<vmem>>, vector<24x256xf32>
    %cst = arith.constant dense<0.000000e+00> : vector<16x256xf32>
    %2 = tpu.matmul %0, %1, %cst {dimension_numbers = #tpu.dot_dimension_numbers<[1], [0], [0], [1], [0, 0, 1, 1], [], []>} : vector<16x24xf32>, vector<24x256xf32>, vector<16x256xf32> -> vector<16x256xf32>
    %c0_3 = arith.constant 0 : index
    %c0_4 = arith.constant 0 : index
    %3 = vector.load %arg3[%c0_3, %c0_4] : memref<1x256xf32, #tpu.memory_space<vmem>>, vector<1x256xf32>
    %4 = vector.broadcast %3 : vector<1x256xf32> to vector<16x256xf32>
    %5 = arith.addf %2, %4 : vector<16x256xf32>
    %6 = arith.negf %5 : vector<16x256xf32>
    %7 = math.exp %6 : vector<16x256xf32>
    %cst_5 = arith.constant 1.000000e+00 : f32
    %8 = vector.broadcast %cst_5 : f32 to vector<16x256xf32>
    %9 = arith.addf %8, %7 : vector<16x256xf32>
    %10 = arith.divf %8, %9 : vector<16x256xf32>
    %11 = arith.mulf %5, %10 : vector<16x256xf32>
    %c0_6 = arith.constant 0 : index
    %c0_7 = arith.constant 0 : index
    %12 = vector.load %arg4[%c0_6, %c0_7] : memref<256x256xf32, #tpu.memory_space<vmem>>, vector<256x256xf32>
    %cst_8 = arith.constant dense<0.000000e+00> : vector<16x256xf32>
    %13 = tpu.matmul %11, %12, %cst_8 {dimension_numbers = #tpu.dot_dimension_numbers<[1], [0], [0], [1], [0, 0, 1, 1], [], []>} : vector<16x256xf32>, vector<256x256xf32>, vector<16x256xf32> -> vector<16x256xf32>
    %c0_9 = arith.constant 0 : index
    %c0_10 = arith.constant 0 : index
    %14 = vector.load %arg5[%c0_9, %c0_10] : memref<1x256xf32, #tpu.memory_space<vmem>>, vector<1x256xf32>
    %15 = vector.broadcast %14 : vector<1x256xf32> to vector<16x256xf32>
    %16 = arith.addf %13, %15 : vector<16x256xf32>
    %17 = arith.negf %16 : vector<16x256xf32>
    %18 = math.exp %17 : vector<16x256xf32>
    %cst_11 = arith.constant 1.000000e+00 : f32
    %19 = vector.broadcast %cst_11 : f32 to vector<16x256xf32>
    %20 = arith.addf %19, %18 : vector<16x256xf32>
    %21 = arith.divf %19, %20 : vector<16x256xf32>
    %22 = arith.mulf %16, %21 : vector<16x256xf32>
    %23 = arith.addf %11, %22 : vector<16x256xf32>
    %c0_12 = arith.constant 0 : index
    %c0_13 = arith.constant 0 : index
    %24 = vector.load %arg6[%c0_12, %c0_13] : memref<256x256xf32, #tpu.memory_space<vmem>>, vector<256x256xf32>
    %cst_14 = arith.constant dense<0.000000e+00> : vector<16x256xf32>
    %25 = tpu.matmul %23, %24, %cst_14 {dimension_numbers = #tpu.dot_dimension_numbers<[1], [0], [0], [1], [0, 0, 1, 1], [], []>} : vector<16x256xf32>, vector<256x256xf32>, vector<16x256xf32> -> vector<16x256xf32>
    %c0_15 = arith.constant 0 : index
    %c0_16 = arith.constant 0 : index
    %26 = vector.load %arg7[%c0_15, %c0_16] : memref<1x256xf32, #tpu.memory_space<vmem>>, vector<1x256xf32>
    %27 = vector.broadcast %26 : vector<1x256xf32> to vector<16x256xf32>
    %28 = arith.addf %25, %27 : vector<16x256xf32>
    %29 = arith.negf %28 : vector<16x256xf32>
    %30 = math.exp %29 : vector<16x256xf32>
    %cst_17 = arith.constant 1.000000e+00 : f32
    %31 = vector.broadcast %cst_17 : f32 to vector<16x256xf32>
    %32 = arith.addf %31, %30 : vector<16x256xf32>
    %33 = arith.divf %31, %32 : vector<16x256xf32>
    %34 = arith.mulf %28, %33 : vector<16x256xf32>
    %35 = arith.addf %23, %34 : vector<16x256xf32>
    %c0_18 = arith.constant 0 : index
    %c0_19 = arith.constant 0 : index
    %36 = vector.load %arg8[%c0_18, %c0_19] : memref<256x256xf32, #tpu.memory_space<vmem>>, vector<256x256xf32>
    %cst_20 = arith.constant dense<0.000000e+00> : vector<16x256xf32>
    %37 = tpu.matmul %35, %36, %cst_20 {dimension_numbers = #tpu.dot_dimension_numbers<[1], [0], [0], [1], [0, 0, 1, 1], [], []>} : vector<16x256xf32>, vector<256x256xf32>, vector<16x256xf32> -> vector<16x256xf32>
    %c0_21 = arith.constant 0 : index
    %c0_22 = arith.constant 0 : index
    %38 = vector.load %arg9[%c0_21, %c0_22] : memref<1x256xf32, #tpu.memory_space<vmem>>, vector<1x256xf32>
    %39 = vector.broadcast %38 : vector<1x256xf32> to vector<16x256xf32>
    %40 = arith.addf %37, %39 : vector<16x256xf32>
    %41 = arith.negf %40 : vector<16x256xf32>
    %42 = math.exp %41 : vector<16x256xf32>
    %cst_23 = arith.constant 1.000000e+00 : f32
    %43 = vector.broadcast %cst_23 : f32 to vector<16x256xf32>
    %44 = arith.addf %43, %42 : vector<16x256xf32>
    %45 = arith.divf %43, %44 : vector<16x256xf32>
    %46 = arith.mulf %40, %45 : vector<16x256xf32>
    %47 = arith.addf %35, %46 : vector<16x256xf32>
    %c0_24 = arith.constant 0 : index
    %c0_25 = arith.constant 0 : index
    %48 = vector.load %arg10[%c0_24, %c0_25] : memref<256x256xf32, #tpu.memory_space<vmem>>, vector<256x256xf32>
    %cst_26 = arith.constant dense<0.000000e+00> : vector<16x256xf32>
    %49 = tpu.matmul %47, %48, %cst_26 {dimension_numbers = #tpu.dot_dimension_numbers<[1], [0], [0], [1], [0, 0, 1, 1], [], []>} : vector<16x256xf32>, vector<256x256xf32>, vector<16x256xf32> -> vector<16x256xf32>
    %c0_27 = arith.constant 0 : index
    %c0_28 = arith.constant 0 : index
    %50 = vector.load %arg11[%c0_27, %c0_28] : memref<1x256xf32, #tpu.memory_space<vmem>>, vector<1x256xf32>
    %51 = vector.broadcast %50 : vector<1x256xf32> to vector<16x256xf32>
    %52 = arith.addf %49, %51 : vector<16x256xf32>
    %53 = vector.extract_strided_slice %52 {offsets = [0, 0], sizes = [16, 128], strides = [1, 1]} : vector<16x256xf32> to vector<16x128xf32>
    %54 = vector.extract_strided_slice %52 {offsets = [0, 128], sizes = [16, 128], strides = [1, 1]} : vector<16x256xf32> to vector<16x128xf32>
    %c0_29 = arith.constant 0 : index
    %c0_30 = arith.constant 0 : index
    %55 = vector.load %arg13[%c0_29, %c0_30] : memref<1x128xf32, #tpu.memory_space<vmem>>, vector<1x128xf32>
    %c0_31 = arith.constant 0 : index
    %c0_32 = arith.constant 0 : index
    %56 = vector.load %arg12[%c0_31, %c0_32] : memref<1x128xf32, #tpu.memory_space<vmem>>, vector<1x128xf32>
    %57 = vector.broadcast %55 : vector<1x128xf32> to vector<16x128xf32>
    %58 = arith.subf %57, %54 : vector<16x128xf32>
    %cst_33 = arith.constant 0.000000e+00 : f32
    %59 = vector.broadcast %cst_33 : f32 to vector<16x128xf32>
    %60 = arith.maximumf %58, %59 : vector<16x128xf32>
    %61 = vector.broadcast %cst_33 : f32 to vector<16x128xf32>
    %62 = arith.subf %58, %61 : vector<16x128xf32>
    %63 = arith.cmpf one, %62, %62 : vector<16x128xf32>
    %64 = vector.broadcast %cst_33 : f32 to vector<16x128xf32>
    %65 = arith.addf %58, %64 : vector<16x128xf32>
    %66 = math.absf %62 : vector<16x128xf32>
    %cst_34 = arith.constant 0.000000e+00 : f32
    %67 = vector.broadcast %cst_34 : f32 to vector<16x128xf32>
    %68 = arith.subf %67, %66 : vector<16x128xf32>
    %69 = math.exp %68 : vector<16x128xf32>
    %70 = math.log1p %69 : vector<16x128xf32>
    %71 = arith.addf %60, %70 : vector<16x128xf32>
    %72 = arith.select %63, %65, %71 : vector<16x128xi1>, vector<16x128xf32>
    %73 = vector.broadcast %55 : vector<1x128xf32> to vector<16x128xf32>
    %74 = arith.subf %73, %72 : vector<16x128xf32>
    %75 = vector.broadcast %56 : vector<1x128xf32> to vector<16x128xf32>
    %76 = arith.subf %74, %75 : vector<16x128xf32>
    %cst_35 = arith.constant 0.000000e+00 : f32
    %77 = vector.broadcast %cst_35 : f32 to vector<16x128xf32>
    %78 = arith.maximumf %76, %77 : vector<16x128xf32>
    %79 = vector.broadcast %cst_35 : f32 to vector<16x128xf32>
    %80 = arith.subf %76, %79 : vector<16x128xf32>
    %81 = arith.cmpf one, %80, %80 : vector<16x128xf32>
    %82 = vector.broadcast %cst_35 : f32 to vector<16x128xf32>
    %83 = arith.addf %76, %82 : vector<16x128xf32>
    %84 = math.absf %80 : vector<16x128xf32>
    %cst_36 = arith.constant 0.000000e+00 : f32
    %85 = vector.broadcast %cst_36 : f32 to vector<16x128xf32>
    %86 = arith.subf %85, %84 : vector<16x128xf32>
    %87 = math.exp %86 : vector<16x128xf32>
    %88 = math.log1p %87 : vector<16x128xf32>
    %89 = arith.addf %78, %88 : vector<16x128xf32>
    %90 = arith.select %81, %83, %89 : vector<16x128xi1>, vector<16x128xf32>
    %91 = vector.broadcast %56 : vector<1x128xf32> to vector<16x128xf32>
    %92 = arith.addf %91, %90 : vector<16x128xf32>
    %c0_37 = arith.constant 0 : index
    %c0_38 = arith.constant 0 : index
    %93 = vector.load %arg14[%c0_37, %c0_38] : memref<16x128xf32, #tpu.memory_space<vmem>>, vector<16x128xf32>
    tpu.vector_store %arg14[%c0_37, %c0_38], %53 {strides = array<i32>} : memref<16x128xf32, #tpu.memory_space<vmem>>, vector<16x128xf32>,
    %c0_39 = arith.constant 0 : index
    %c0_40 = arith.constant 0 : index
    %94 = vector.load %arg15[%c0_39, %c0_40] : memref<16x128xf32, #tpu.memory_space<vmem>>, vector<16x128xf32>
    tpu.vector_store %arg15[%c0_39, %c0_40], %92 {strides = array<i32>} : memref<16x128xf32, #tpu.memory_space<vmem>>, vector<16x128xf32>,
    return
  }
  func.func @transform_0(%arg0: i32) -> (i32, i32) {
    %c0_i32 = arith.constant 0 : i32
    %c0_i32_0 = arith.constant 0 : i32
    return %arg0, %c0_i32 : i32, i32
  }
  func.func @transform_1(%arg0: i32) -> (i32, i32) {
    %c0_i32 = arith.constant 0 : i32
    %c0_i32_0 = arith.constant 0 : i32
    %c0_i32_1 = arith.constant 0 : i32
    return %c0_i32, %c0_i32_0 : i32, i32
  }
  func.func @transform_2(%arg0: i32) -> (i32, i32) {
    %c0_i32 = arith.constant 0 : i32
    %c0_i32_0 = arith.constant 0 : i32
    %c0_i32_1 = arith.constant 0 : i32
    return %c0_i32, %c0_i32_0 : i32, i32
  }
  func.func @transform_3(%arg0: i32) -> (i32, i32) {
    %c0_i32 = arith.constant 0 : i32
    %c0_i32_0 = arith.constant 0 : i32
    %c0_i32_1 = arith.constant 0 : i32
    return %c0_i32, %c0_i32_0 : i32, i32
  }
  func.func @transform_4(%arg0: i32) -> (i32, i32) {
    %c0_i32 = arith.constant 0 : i32
    %c0_i32_0 = arith.constant 0 : i32
    %c0_i32_1 = arith.constant 0 : i32
    return %c0_i32, %c0_i32_0 : i32, i32
  }
  func.func @transform_5(%arg0: i32) -> (i32, i32) {
    %c0_i32 = arith.constant 0 : i32
    %c0_i32_0 = arith.constant 0 : i32
    %c0_i32_1 = arith.constant 0 : i32
    return %c0_i32, %c0_i32_0 : i32, i32
  }
  func.func @transform_6(%arg0: i32) -> (i32, i32) {
    %c0_i32 = arith.constant 0 : i32
    %c0_i32_0 = arith.constant 0 : i32
    %c0_i32_1 = arith.constant 0 : i32
    return %c0_i32, %c0_i32_0 : i32, i32
  }
  func.func @transform_7(%arg0: i32) -> (i32, i32) {
    %c0_i32 = arith.constant 0 : i32
    %c0_i32_0 = arith.constant 0 : i32
    %c0_i32_1 = arith.constant 0 : i32
    return %c0_i32, %c0_i32_0 : i32, i32
  }
  func.func @transform_8(%arg0: i32) -> (i32, i32) {
    %c0_i32 = arith.constant 0 : i32
    %c0_i32_0 = arith.constant 0 : i32
    %c0_i32_1 = arith.constant 0 : i32
    return %c0_i32, %c0_i32_0 : i32, i32
  }
  func.func @transform_9(%arg0: i32) -> (i32, i32) {
    %c0_i32 = arith.constant 0 : i32
    %c0_i32_0 = arith.constant 0 : i32
    %c0_i32_1 = arith.constant 0 : i32
    return %c0_i32, %c0_i32_0 : i32, i32
  }
  func.func @transform_10(%arg0: i32) -> (i32, i32) {
    %c0_i32 = arith.constant 0 : i32
    %c0_i32_0 = arith.constant 0 : i32
    %c0_i32_1 = arith.constant 0 : i32
    return %c0_i32, %c0_i32_0 : i32, i32
  }
  func.func @transform_11(%arg0: i32) -> (i32, i32) {
    %c0_i32 = arith.constant 0 : i32
    %c0_i32_0 = arith.constant 0 : i32
    %c0_i32_1 = arith.constant 0 : i32
    return %c0_i32, %c0_i32_0 : i32, i32
  }
  func.func @transform_12(%arg0: i32) -> (i32, i32) {
    %c0_i32 = arith.constant 0 : i32
    %c0_i32_0 = arith.constant 0 : i32
    %c0_i32_1 = arith.constant 0 : i32
    return %c0_i32, %c0_i32_0 : i32, i32
  }
  func.func @transform_13(%arg0: i32) -> (i32, i32) {
    %c0_i32 = arith.constant 0 : i32
    %c0_i32_0 = arith.constant 0 : i32
    return %arg0, %c0_i32 : i32, i32
  }
  func.func @transform_14(%arg0: i32) -> (i32, i32) {
    %c0_i32 = arith.constant 0 : i32
    %c0_i32_0 = arith.constant 0 : i32
    return %arg0, %c0_i32 : i32, i32
  }
}

</mosaic_0001>

<bundles_post_ra>
// kernel: tpu_custom_call.1
= control target key start
LH: loop header
LB: loop body
LE: loop exit
PB: predicated region body
PF: predicated region fallthrough
CT: control target
= control target key end

     0   :  { %20 = vsyncpa [#allocation3], 0  ;;  %s1964_s0 = inlined_call_operand.hbm [shape: f32[16,24], index: 0, kind: input, shape index: {}]   ;;  %s1965_s1 = inlined_call_operand.hbm [shape: f32[24,256], index: 1, kind: input, shape index: {}]   ;;  %s1966_s2 = inlined_call_operand.vmem [shape: f32[1,256], index: 2, kind: input, shape index: {}]   ;;  %s1967_s3 = inlined_call_operand.hbm [shape: f32[256,256], index: 3, kind: input, shape index: {}]   ;;  %s1968_s4 = inlined_call_operand.vmem [shape: f32[1,256], index: 4, kind: input, shape index: {}]   ;;  %s1969_s5 = inlined_call_operand.hbm [shape: f32[256,256], index: 5, kind: input, shape index: {}]   ;;  %s1970_s6 = inlined_call_operand.vmem [shape: f32[1,256], index: 6, kind: input, shape index: {}]   ;;  %s1971_s7 = inlined_call_operand.hbm [shape: f32[256,256], index: 7, kind: input, shape index: {}]   ;;  %s1972_s8 = inlined_call_operand.vmem [shape: f32[1,256], index: 8, kind: input, shape index: {}]   ;;  %s1973_s9 = inlined_call_operand.hbm [shape: f32[256,256], index: 9, kind: input, shape index: {}]   ;;  %s1974_s10 = inlined_call_operand.vmem [shape: f32[1,256], index: 10, kind: input, shape index: {}]   ;;  %s1975_s11 = inlined_call_operand.vmem [shape: f32[1,128], index: 11, kind: input, shape index: {}]   ;;  %s1976_s12 = inlined_call_operand.vmem [shape: f32[1,128], index: 12, kind: input, shape index: {}]   ;;  %s1977_s13 = inlined_call_operand.hbm [shape: f32[16,128], index: 13, kind: output, shape index: {0}]   ;;  %s1978_s14 = inlined_call_operand.hbm [shape: f32[16,128], index: 14, kind: output, shape index: {1}]  }
   0x1   :  { %21 = vsyncpa [#allocation6], 0 }
   0x2   :  { %22 = vsyncpa [#allocation9], 0 }
   0x3   :  { %23 = vsyncpa [#allocation12], 0 }
   0x4   :  { %24 = vsyncpa [#allocation4], 0 }
   0x5   :  { %25 = vsyncpa [#allocation15], 0  ;;  %s1665_s29 = smov [#allocation5]   ;;  %s1477_s17 = scalar_lea.hbm %s1965_s1, 768 }
   0x6   :  { %s43_s30 = sshll.u32 %s1665_s29, 4  ;;  %p1478_p0 = scmp.ne.s32.totalorder %s1965_s1, %s1477_s17  ;;  %s44_s30 = int_to_ptr.vmem [resolvable:$true] %s43_s30 }
   0x7   :  { %p1481_p1 = scmp.lt.u32.totalorder %s1477_s17, %s1965_s1 }
   0x9   :  { %p1483_p2 = pnand %p1481_p1, %p1478_p0 }
   0xb   :  { %1486 = shalt.err (!%p1483_p2)
}
   0xc   :  { %s1487_s22 = scalar_lea.vmem %s44_s30, 768  ;;  %p1492_p4 = scmp.lt.s32.totalorder %s44_s30, %s44_s30 }
   0xd   :  { %p1488_p3 = scmp.ne.s32.totalorder %s44_s30, %s1487_s22  ;;  %p1493_p5 = scmp.lt.s32.totalorder %s1487_s22, %s1487_s22 }
   0xf   :  { %p1494_p6 = por %p1493_p5, %p1492_p4 }
  0x11   :  { %p1495_p7 = pnand %p1494_p6, %p1488_p3 }
  0x13   :  { %1498 = shalt.err (!%p1495_p7)
}
  0x14   :  { %s1666_s23 = smov 256   ;;  %s1667_s24 = smov 16  }
  0x15   :  { %49 = dma.hbm_to_vmem [thread:$0]  %s1965_s1, 768, %s44_s30, [#allocation6], %s1666_s23, %s1666_s23, %s1667_s24  }
  0x16   :  { %s1668_s27 = smov [#allocation8]   ;;  %s1669_s29 = smov [#allocation2]  }
  0x17   :  { %s71_s28 = sshll.u32 %s1668_s27, 4  ;;  %s31_s15 = sshll.u32 %s1669_s29, 4  ;;  %s72_s28 = int_to_ptr.vmem [resolvable:$true] %s71_s28  ;;  %s32_s15 = int_to_ptr.vmem [resolvable:$true] %s31_s15 }
  0x18   :  { %s1499_s18 = scalar_lea.hbm %s1969_s5, 8192 }
  0x19   :  { %p1500_p8 = scmp.ne.s32.totalorder %s1969_s5, %s1499_s18  ;;  %p1503_p9 = scmp.lt.u32.totalorder %s1499_s18, %s1969_s5 }
  0x1b   :  { %p1505_p10 = pnand %p1503_p9, %p1500_p8 }
  0x1d   :  { %1508 = shalt.err (!%p1505_p10)
}
  0x1e   :  { %s1509_s1 = scalar_lea.vmem %s72_s28, 8192  ;;  %p1514_p12 = scmp.lt.s32.totalorder %s72_s28, %s72_s28 }
  0x1f   :  { %p1510_p11 = scmp.ne.s32.totalorder %s72_s28, %s1509_s1  ;;  %p1515_p13 = scmp.lt.s32.totalorder %s1509_s1, %s1509_s1 }
  0x21   :  { %p1516_p0 = por %p1515_p13, %p1514_p12 }
  0x23   :  { %p1517_p1 = pnand %p1516_p0, %p1510_p11 }
  0x25   :  { %1520 = shalt.err (!%p1517_p1)
}
  0x26   :  { %77 = dma.hbm_to_vmem [thread:$0]  %s1969_s5, 8192, %s72_s28, [#allocation9], %s1666_s23, %s1666_s23, %s1667_s24  }
  0x27   :  { %s1521_s29 = scalar_lea.hbm %s1964_s0, 256 }
  0x28   :  { %p1522_p2 = scmp.ne.s32.totalorder %s1964_s0, %s1521_s29  ;;  %p1525_p3 = scmp.lt.u32.totalorder %s1521_s29, %s1964_s0 }
  0x2a   :  { %p1527_p4 = pnand %p1525_p3, %p1522_p2 }
  0x2c   :  { %1530 = shalt.err (!%p1527_p4)
}
  0x2d   :  { %s1531_s20 = scalar_lea.vmem %s32_s15, 256  ;;  %p1536_p6 = scmp.lt.s32.totalorder %s32_s15, %s32_s15 }
  0x2e   :  { %p1532_p5 = scmp.ne.s32.totalorder %s32_s15, %s1531_s20  ;;  %p1537_p7 = scmp.lt.s32.totalorder %s1531_s20, %s1531_s20 }
  0x30   :  { %p1538_p8 = por %p1537_p7, %p1536_p6 }
  0x32   :  { %p1539_p9 = pnand %p1538_p8, %p1532_p5 }
  0x34   :  { %1542 = shalt.err (!%p1539_p9)
}
  0x35   :  { %s1670_s5 = smov 128   ;;  %s1671_s28 = smov 8  }
  0x36   :  { %37 = dma.hbm_to_vmem [thread:$0]  %s1964_s0, 256, %s32_s15, [#allocation3], %s1670_s5, %s1670_s5, %s1671_s28  }
  0x37   :  { %s1672_s1 = smov [#allocation7]   ;;  %s1673_s25 = smov [#allocation10]  }
  0x38   :  { %s57_s30 = sshll.u32 %s1672_s1, 4  ;;  %s85_s26 = sshll.u32 %s1673_s25, 4  ;;  %s58_s30 = int_to_ptr.vmem [resolvable:$true] %s57_s30  ;;  %s86_s26 = int_to_ptr.vmem [resolvable:$true] %s85_s26 }
  0x39   :  { %s1543_s16 = scalar_lea.hbm %s1967_s3, 8192 }
  0x3a   :  { %p1544_p10 = scmp.ne.s32.totalorder %s1967_s3, %s1543_s16  ;;  %p1547_p11 = scmp.lt.u32.totalorder %s1543_s16, %s1967_s3 }
  0x3c   :  { %p1549_p12 = pnand %p1547_p11, %p1544_p10 }
  0x3e   :  { %1552 = shalt.err (!%p1549_p12)
}
  0x3f   :  { %s1553_s0 = scalar_lea.vmem %s58_s30, 8192  ;;  %p1558_p0 = scmp.lt.s32.totalorder %s58_s30, %s58_s30 }
  0x40   :  { %p1554_p13 = scmp.ne.s32.totalorder %s58_s30, %s1553_s0  ;;  %p1559_p1 = scmp.lt.s32.totalorder %s1553_s0, %s1553_s0 }
  0x42   :  { %p1560_p2 = por %p1559_p1, %p1558_p0 }
  0x44   :  { %p1561_p3 = pnand %p1560_p2, %p1554_p13 }
  0x46   :  { %1564 = shalt.err (!%p1561_p3)
}
  0x47   :  { %63 = dma.hbm_to_vmem [thread:$0]  %s1967_s3, 8192, %s58_s30, [#allocation6], %s1666_s23, %s1666_s23, %s1667_s24  }
  0x48   :  { %s1565_s25 = scalar_lea.hbm %s1971_s7, 8192 }
  0x49   :  { %p1566_p4 = scmp.ne.s32.totalorder %s1971_s7, %s1565_s25  ;;  %p1569_p5 = scmp.lt.u32.totalorder %s1565_s25, %s1971_s7 }
  0x4b   :  { %p1571_p6 = pnand %p1569_p5, %p1566_p4 }
  0x4d   :  { %1574 = shalt.err (!%p1571_p6)
}
  0x4e   :  { %s1575_s18 = scalar_lea.vmem %s86_s26, 8192  ;;  %p1580_p8 = scmp.lt.s32.totalorder %s86_s26, %s86_s26 }
  0x4f   :  { %p1576_p7 = scmp.ne.s32.totalorder %s86_s26, %s1575_s18  ;;  %p1581_p9 = scmp.lt.s32.totalorder %s1575_s18, %s1575_s18 }
  0x51   :  { %p1582_p10 = por %p1581_p9, %p1580_p8 }
  0x53   :  { %p1583_p11 = pnand %p1582_p10, %p1576_p7 }
  0x55   :  { %1586 = shalt.err (!%p1583_p11)
}
  0x56   :  { %91 = dma.hbm_to_vmem [thread:$0]  %s1971_s7, 8192, %s86_s26, [#allocation9], %s1666_s23, %s1666_s23, %s1667_s24  }
  0x57   :  { %s1674_s19 = smov [#allocation11]   ;;  %s1587_s21 = scalar_lea.hbm %s1973_s9, 8192 }
  0x58   :  { %s99_s20 = sshll.u32 %s1674_s19, 4  ;;  %p1588_p12 = scmp.ne.s32.totalorder %s1973_s9, %s1587_s21  ;;  %s100_s20 = int_to_ptr.vmem [resolvable:$true] %s99_s20 }
  0x59   :  { %p1591_p13 = scmp.lt.u32.totalorder %s1587_s21, %s1973_s9 }
  0x5b   :  { %p1593_p0 = pnand %p1591_p13, %p1588_p12 }
  0x5d   :  { %1596 = shalt.err (!%p1593_p0)
}
  0x5e   :  { %s1597_s29 = scalar_lea.vmem %s100_s20, 8192  ;;  %p1602_p2 = scmp.lt.s32.totalorder %s100_s20, %s100_s20 }
  0x5f   :  { %p1598_p1 = scmp.ne.s32.totalorder %s100_s20, %s1597_s29  ;;  %p1603_p3 = scmp.lt.s32.totalorder %s1597_s29, %s1597_s29 }
  0x61   :  { %p1604_p4 = por %p1603_p3, %p1602_p2 }
  0x63   :  { %p1605_p5 = pnand %p1604_p4, %p1598_p1 }
  0x65   :  { %1608 = shalt.err (!%p1605_p5)
}
  0x66   :  { %105 = dma.hbm_to_vmem [thread:$0]  %s1973_s9, 8192, %s100_s20, [#allocation12], %s1666_s23, %s1666_s23, %s1667_s24  }
  0x67   :  { %1653 = dma.done.wait [#allocation3], 256  }
  0x68   :  { %1654 = vsyncadd [#allocation3], 4294967040 }
  0x69   :  { %1655 = dma.done.wait [#allocation6], 8960  }
  0x6a   :  { %1656 = vsyncadd [#allocation6], 4294958336 }
  0x6b   :  { %1657 = dma.done.wait [#allocation9], 16384  }
  0x6c   :  { %1658 = vsyncadd [#allocation9], 4294950912 }
  0x6d   :  { %1659 = dma.done.wait [#allocation12], 8192  }
  0x6e   :  { %1660 = vsyncadd [#allocation12], 4294959104  ;;  %v1675_v0 = vmov 0.0   ;;  %v133_v1 = vld [vmem:[#allocation5 + $0x8] sm:$0xff]  ;;  %v135_v2 = vld [vmem:[#allocation5 + $0x18] sm:$0xff]  ;;  %vm150_vm0 = vcmask 195584  }
  0x6f   :  { %221 = vmatprep.mubr.f32.mxu0 %v1675_v0  ;;  %v132_v3 = vld [vmem:[#allocation5] sm:$0xff]  ;;  %v1124_v4 = vpack.c.bf16 %v135_v2, %v133_v1  ;;  %v134_v5 = vld [vmem:[#allocation5 + $0x10] sm:$0xff]  ;;  %v137_v7 = vld [vmem:[#allocation5 + $0x28] sm:$0xff]  ;;  %s1676_s19 = smov [#allocation13]  }
  0x70   :  { %v1126_v6 = vpack.c.bf16 %v134_v5, %v132_v3  ;;  %v263_v8 = vld [vmem:[#allocation7 + $0x8] sm:$0xff]  ;;  %v136_v9 = vld [vmem:[#allocation5 + $0x20] sm:$0xff]  ;;  %v265_v10 = vld [vmem:[#allocation7 + $0x18] sm:$0xff]  ;;  %s1073_s20 = sshll.u32 %s1676_s19, 4  ;;  %s1074_s20 = int_to_ptr.vmem [resolvable:$true] %s1073_s20 }
  0x71   :  { %1125 = vmatprep.subr.bf16.mxu0 %v1124_v4  ;;  %v262_v11 = vld [vmem:[#allocation7] sm:$0xff]  ;;  %v264_v12 = vld [vmem:[#allocation7 + $0x10] sm:$0xff]  ;;  %v1128_v13 = vpack.c.bf16 %v265_v10, %v263_v8  ;;  %v267_v15 = vld [vmem:[#allocation7 + $0x28] sm:$0xff]  ;;  %p1614_p7 = scmp.lt.s32.totalorder %s1074_s20, %s1074_s20 }
  0x72   :  { %1127 = vmatpush1.bf16.msra.mxu0 %v1126_v6  ;;  %v1130_v14 = vpack.c.bf16 %v264_v12, %v262_v11  ;;  %v269_v16 = vld [vmem:[#allocation7 + $0x38] sm:$0xff]  ;;  %v266_v17 = vld [vmem:[#allocation7 + $0x20] sm:$0xff]  ;;  %v268_v19 = vld [vmem:[#allocation7 + $0x30] sm:$0xff] }
  0x73   :  { %161 = vmatprep.subr.mxu0 %v137_v7  ;;  %v1132_v18 = vpack.c.bf16 %v269_v16, %v267_v15  ;;  %v271_v20 = vld [vmem:[#allocation7 + $0x48] sm:$0xff]  ;;  %v273_v21 = vld [vmem:[#allocation7 + $0x58] sm:$0xff]  ;;  %v130_v22 = vld [vmem:[#allocation2] sm:$0xff]  ;;  %1129 = vmatprep.subr.bf16.mxu1 %v1128_v13  ;;  %v1134_v23 = vpack.c.bf16 %v268_v19, %v266_v17 }
  0x74   :  { %1131 = vmatpush1.bf16.msra.mxu1 %v1130_v14  ;;  %v1136_v24 = vpack.c.bf16 %v273_v21, %v271_v20  ;;  %v270_v25 = vld [vmem:[#allocation7 + $0x40] sm:$0xff]  ;;  %v272_v26 = vld [vmem:[#allocation7 + $0x50] sm:$0xff]  ;;  %v275_v27 = vld [vmem:[#allocation7 + $0x68] sm:$0xff] }
  0x75   :  { %1133 = vmatprep.subr.bf16.mxu1 %v1132_v18  ;;  %v277_v28 = vld [vmem:[#allocation7 + $0x78] sm:$0xff]  ;;  %v131_v29 = vld [vmem:[#allocation2 + $0x8] sm:$0xff]  ;;  %v1138_v30 = vpack.c.bf16 %v272_v26, %v270_v25  ;;  %v274_v32 = vld [vmem:[#allocation7 + $0x60] sm:$0xff] }
  0x76   :  { %162 = vmatpush1.msra.mxu0 %v136_v9  ;;  %v1140_v31 = vpack.c.bf16 %v277_v28, %v275_v27  ;;  %v276_v33 = vld [vmem:[#allocation7 + $0x70] sm:$0xff]  ;;  %v279_v34 = vld [vmem:[#allocation7 + $0x88] sm:$0xff]  ;;  %v281_v35 = vld [vmem:[#allocation7 + $0x98] sm:$0xff] }
  0x77   :  { %1104 = vmatmul.mubr.msk.f32.vlgmr.msra.gmra.mrb[0].mxu0 %vm150_vm0, %v130_v22  ;;  %v1142_v36 = vpack.c.bf16 %v276_v33, %v274_v32  ;;  %v1144_v37 = vpack.c.bf16 %v281_v35, %v279_v34  ;;  %v278_v38 = vld [vmem:[#allocation7 + $0x80] sm:$0xff]  ;;  %v280_v39 = vld [vmem:[#allocation7 + $0x90] sm:$0xff]  ;;  %v283_v40 = vld [vmem:[#allocation7 + $0xa8] sm:$0xff] }
  0x78   :  { %227 = vmatprep.mubr.f32.mxu0 %v1675_v0  ;;  %1135 = vmatpush1.bf16.msra.mxu1 %v1134_v23  ;;  %v285_v41 = vld [vmem:[#allocation7 + $0xb8] sm:$0xff]  ;;  %v1146_v42 = vpack.c.bf16 %v280_v39, %v278_v38  ;;  %v282_v44 = vld [vmem:[#allocation7 + $0xa0] sm:$0xff]  ;;  %v284_v45 = vld [vmem:[#allocation7 + $0xb0] sm:$0xff] }
  0x79   :  { %1137 = vmatprep.subr.bf16.mxu1 %v1136_v24  ;;  %v1148_v43 = vpack.c.bf16 %v285_v41, %v283_v40  ;;  %v287_v46 = vld [vmem:[#allocation7 + $0xc8] sm:$0xff]  ;;  %v289_v47 = vld [vmem:[#allocation7 + $0xd8] sm:$0xff]  ;;  %v1150_v48 = vpack.c.bf16 %v284_v45, %v282_v44  ;;  %v286_v50 = vld [vmem:[#allocation7 + $0xc0] sm:$0xff] }
  0x7a   :  { %v1152_v49 = vpack.c.bf16 %v289_v47, %v287_v46  ;;  %v288_v51 = vld [vmem:[#allocation7 + $0xd0] sm:$0xff]  ;;  %v291_v52 = vld [vmem:[#allocation7 + $0xe8] sm:$0xff]  ;;  %v293_v53 = vld [vmem:[#allocation7 + $0xf8] sm:$0xff] }
  0x7b   :  { %1105 = vmatmul.mubr.msk.f32.gmra.mrb[2].mxu0 %vm150_vm0, %v131_v29  ;;  %v1154_v54 = vpack.c.bf16 %v288_v51, %v286_v50  ;;  %v1156_v55 = vpack.c.bf16 %v293_v53, %v291_v52  ;;  %v290_v56 = vld [vmem:[#allocation7 + $0xe0] sm:$0xff]  ;;  %v292_v57 = vld [vmem:[#allocation7 + $0xf0] sm:$0xff]  ;;  %v295_v59 = vld [vmem:[#allocation7 + $0x108] sm:$0xff] }
  0x7c   :  { %1139 = vmatpush1.bf16.msra.mxu1 %v1138_v30  ;;  %v1158_v58 = vpack.c.bf16 %v292_v57, %v290_v56  ;;  %v297_v60 = vld [vmem:[#allocation7 + $0x118] sm:$0xff]  ;;  %v294_v62 = vld [vmem:[#allocation7 + $0x100] sm:$0xff]  ;;  %v296_v63 = vld [vmem:[#allocation7 + $0x110] sm:$0xff] }
  0x7d   :  { %1141 = vmatprep.subr.bf16.mxu1 %v1140_v31  ;;  %v1160_v61 = vpack.c.bf16 %v297_v60, %v295_v59  ;;  %v1162_v0 = vpack.c.bf16 %v296_v63, %v294_v62  ;;  %v299_v1 = vld [vmem:[#allocation7 + $0x128] sm:$0xff]  ;;  %v301_v2 = vld [vmem:[#allocation7 + $0x138] sm:$0xff]  ;;  %v298_v4 = vld [vmem:[#allocation7 + $0x120] sm:$0xff] }
  0x7e   :  { %v1164_v3 = vpack.c.bf16 %v301_v2, %v299_v1  ;;  %v300_v5 = vld [vmem:[#allocation7 + $0x130] sm:$0xff]  ;;  %v303_v7 = vld [vmem:[#allocation7 + $0x148] sm:$0xff]  ;;  %v305_v8 = vld [vmem:[#allocation7 + $0x158] sm:$0xff] }
  0x7f   :  { %v1166_v6 = vpack.c.bf16 %v300_v5, %v298_v4  ;;  %v1168_v9 = vpack.c.bf16 %v305_v8, %v303_v7  ;;  %v302_v10 = vld [vmem:[#allocation7 + $0x140] sm:$0xff]  ;;  %v304_v11 = vld [vmem:[#allocation7 + $0x150] sm:$0xff]  ;;  %v307_v13 = vld [vmem:[#allocation7 + $0x168] sm:$0xff] }
  0x80   :  { %1143 = vmatpush1.bf16.msra.mxu1 %v1142_v36  ;;  %v1170_v12 = vpack.c.bf16 %v304_v11, %v302_v10  ;;  %v309_v14 = vld [vmem:[#allocation7 + $0x178] sm:$0xff]  ;;  %v306_v16 = vld [vmem:[#allocation7 + $0x160] sm:$0xff]  ;;  %v308_v17 = vld [vmem:[#allocation7 + $0x170] sm:$0xff] }
  0x81   :  { %1145 = vmatprep.subr.bf16.mxu1 %v1144_v37  ;;  %v1172_v15 = vpack.c.bf16 %v309_v14, %v307_v13  ;;  %v1174_v18 = vpack.c.bf16 %v308_v17, %v306_v16  ;;  %v311_v19 = vld [vmem:[#allocation7 + $0x188] sm:$0xff]  ;;  %v313_v20 = vld [vmem:[#allocation7 + $0x198] sm:$0xff]  ;;  %v310_v22 = vld [vmem:[#allocation7 + $0x180] sm:$0xff] }
  0x82   :  { %v1176_v21 = vpack.c.bf16 %v313_v20, %v311_v19  ;;  %v312_v23 = vld [vmem:[#allocation7 + $0x190] sm:$0xff]  ;;  %v315_v25 = vld [vmem:[#allocation7 + $0x1a8] sm:$0xff]  ;;  %v317_v26 = vld [vmem:[#allocation7 + $0x1b8] sm:$0xff] }
  0x83   :  { %v1178_v24 = vpack.c.bf16 %v312_v23, %v310_v22  ;;  %v1180_v27 = vpack.c.bf16 %v317_v26, %v315_v25  ;;  %v314_v28 = vld [vmem:[#allocation7 + $0x1a0] sm:$0xff]  ;;  %v316_v29 = vld [vmem:[#allocation7 + $0x1b0] sm:$0xff]  ;;  %v319_v31 = vld [vmem:[#allocation7 + $0x1c8] sm:$0xff] }
  0x84   :  { %1147 = vmatpush1.bf16.msra.mxu1 %v1146_v42  ;;  %v1182_v30 = vpack.c.bf16 %v316_v29, %v314_v28  ;;  %v321_v32 = vld [vmem:[#allocation7 + $0x1d8] sm:$0xff]  ;;  %v318_v34 = vld [vmem:[#allocation7 + $0x1c0] sm:$0xff]  ;;  %v320_v35 = vld [vmem:[#allocation7 + $0x1d0] sm:$0xff] }
  0x85   :  { %1149 = vmatprep.subr.bf16.mxu1 %v1148_v43  ;;  %v1184_v33 = vpack.c.bf16 %v321_v32, %v319_v31  ;;  %v1186_v36 = vpack.c.bf16 %v320_v35, %v318_v34  ;;  %v323_v37 = vld [vmem:[#allocation7 + $0x1e8] sm:$0xff]  ;;  %v325_v38 = vld [vmem:[#allocation7 + $0x1f8] sm:$0xff]  ;;  %v322_v40 = vld [vmem:[#allocation7 + $0x1e0] sm:$0xff] }
  0x86   :  { %v1188_v39 = vpack.c.bf16 %v325_v38, %v323_v37  ;;  %v324_v41 = vld [vmem:[#allocation7 + $0x1f0] sm:$0xff]  ;;  %v448_v43 = vld [vmem:[#allocation8 + $0x8] sm:$0xff]  ;;  %v450_v44 = vld [vmem:[#allocation8 + $0x18] sm:$0xff] }
  0x87   :  { %v1190_v42 = vpack.c.bf16 %v324_v41, %v322_v40  ;;  %v447_v45 = vld [vmem:[#allocation8] sm:$0xff]  ;;  %v1192_v46 = vpack.c.bf16 %v450_v44, %v448_v43  ;;  %v449_v47 = vld [vmem:[#allocation8 + $0x10] sm:$0xff]  ;;  %v460_v60 = vld [vmem:[#allocation8 + $0x68] sm:$0xff] }
  0x88   :  { %1151 = vmatpush1.bf16.msra.mxu1 %v1150_v48  ;;  %v452_v48 = vld [vmem:[#allocation8 + $0x28] sm:$0xff]  ;;  %v1194_v50 = vpack.c.bf16 %v449_v47, %v447_v45  ;;  %v451_v52 = vld [vmem:[#allocation8 + $0x20] sm:$0xff]  ;;  %v453_v53 = vld [vmem:[#allocation8 + $0x30] sm:$0xff] }
  0x89   :  { %1153 = vmatprep.subr.bf16.mxu1 %v1152_v49  ;;  %v454_v49 = vld [vmem:[#allocation8 + $0x38] sm:$0xff]  ;;  %1193 = vmatprep.subr.bf16.mxu0 %v1192_v46  ;;  %v1198_v56 = vpack.c.bf16 %v453_v53, %v451_v52  ;;  %v457_v59 = vld [vmem:[#allocation8 + $0x50] sm:$0xff]  ;;  %v464_v2 = vld [vmem:[#allocation8 + $0x88] sm:$0xff] }
  0x8a   :  { %v1196_v51 = vpack.c.bf16 %v454_v49, %v452_v48  ;;  %1195 = vmatpush1.bf16.msra.mxu0 %v1194_v50  ;;  %v461_v1 = vld [vmem:[#allocation8 + $0x70] sm:$0xff]  ;;  %v468_v8 = vld [vmem:[#allocation8 + $0xa8] sm:$0xff] }
  0x8b   :  { %v465_v7 = vld [vmem:[#allocation8 + $0x90] sm:$0xff]  ;;  %v472_v14 = vld [vmem:[#allocation8 + $0xc8] sm:$0xff] }
  0x8c   :  { %1155 = vmatpush1.bf16.msra.mxu1 %v1154_v54  ;;  %v456_v54 = vld [vmem:[#allocation8 + $0x48] sm:$0xff]  ;;  %1197 = vmatprep.subr.bf16.mxu0 %v1196_v51  ;;  %v469_v13 = vld [vmem:[#allocation8 + $0xb0] sm:$0xff] }
  0x8d   :  { %1157 = vmatprep.subr.bf16.mxu1 %v1156_v55  ;;  %v458_v55 = vld [vmem:[#allocation8 + $0x58] sm:$0xff]  ;;  %v473_v19 = vld [vmem:[#allocation8 + $0xd0] sm:$0xff]  ;;  %v476_v20 = vld [vmem:[#allocation8 + $0xe8] sm:$0xff] }
  0x8e   :  { %v1200_v57 = vpack.c.bf16 %v458_v55, %v456_v54  ;;  %1199 = vmatpush1.bf16.msra.mxu0 %v1198_v56 }
  0x90   :  { %1159 = vmatpush1.bf16.msra.mxu1 %v1158_v58  ;;  %v455_v58 = vld [vmem:[#allocation8 + $0x40] sm:$0xff]  ;;  %1201 = vmatprep.subr.bf16.mxu0 %v1200_v57 }
  0x91   :  { %1161 = vmatprep.subr.bf16.mxu1 %v1160_v61  ;;  %v462_v61 = vld [vmem:[#allocation8 + $0x78] sm:$0xff]  ;;  %v1202_v62 = vpack.c.bf16 %v457_v59, %v455_v58  ;;  %v475_v59 = vld [vmem:[#allocation8 + $0xe0] sm:$0xff] }
  0x92   :  { %v1204_v63 = vpack.c.bf16 %v462_v61, %v460_v60  ;;  %v477_v60 = vld [vmem:[#allocation8 + $0xf0] sm:$0xff] }
  0x93   :  { %1203 = vmatpush1.bf16.msra.mxu0 %v1202_v62  ;;  %v1222_v61 = vpack.c.bf16 %v477_v60, %v475_v59  ;;  %v480_v62 = vld [vmem:[#allocation8 + $0x108] sm:$0xff] }
  0x94   :  { %1163 = vmatpush1.bf16.msra.mxu1 %v1162_v0  ;;  %v459_v0 = vld [vmem:[#allocation8 + $0x60] sm:$0xff]  ;;  %1205 = vmatprep.subr.bf16.mxu0 %v1204_v63  ;;  %v482_v63 = vld [vmem:[#allocation8 + $0x118] sm:$0xff] }
  0x95   :  { %1165 = vmatprep.subr.bf16.mxu1 %v1164_v3  ;;  %v466_v3 = vld [vmem:[#allocation8 + $0x98] sm:$0xff]  ;;  %v1206_v4 = vpack.c.bf16 %v461_v1, %v459_v0  ;;  %v1224_v0 = vpack.c.bf16 %v482_v63, %v480_v62  ;;  %v479_v1 = vld [vmem:[#allocation8 + $0x100] sm:$0xff]  ;;  %v638_v62 = vld [vmem:[#allocation10 + $0x30] sm:$0xff] }
  0x96   :  { %v1208_v5 = vpack.c.bf16 %v466_v3, %v464_v2  ;;  %v481_v2 = vld [vmem:[#allocation8 + $0x110] sm:$0xff]  ;;  %v641_v63 = vld [vmem:[#allocation10 + $0x48] sm:$0xff] }
  0x97   :  { %1207 = vmatpush1.bf16.msra.mxu0 %v1206_v4  ;;  %v1226_v3 = vpack.c.bf16 %v481_v2, %v479_v1  ;;  %v484_v4 = vld [vmem:[#allocation8 + $0x128] sm:$0xff] }
  0x98   :  { %1167 = vmatpush1.bf16.msra.mxu1 %v1166_v6  ;;  %v463_v6 = vld [vmem:[#allocation8 + $0x80] sm:$0xff]  ;;  %1209 = vmatprep.subr.bf16.mxu0 %v1208_v5  ;;  %v486_v5 = vld [vmem:[#allocation8 + $0x138] sm:$0xff] }
  0x99   :  { %1169 = vmatprep.subr.bf16.mxu1 %v1168_v9  ;;  %v470_v9 = vld [vmem:[#allocation8 + $0xb8] sm:$0xff]  ;;  %v1210_v10 = vpack.c.bf16 %v465_v7, %v463_v6  ;;  %v1228_v6 = vpack.c.bf16 %v486_v5, %v484_v4  ;;  %v483_v7 = vld [vmem:[#allocation8 + $0x120] sm:$0xff]  ;;  %v642_v4 = vld [vmem:[#allocation10 + $0x50] sm:$0xff] }
  0x9a   :  { %v1212_v11 = vpack.c.bf16 %v470_v9, %v468_v8  ;;  %v485_v8 = vld [vmem:[#allocation8 + $0x130] sm:$0xff]  ;;  %v645_v5 = vld [vmem:[#allocation10 + $0x68] sm:$0xff] }
  0x9b   :  { %1211 = vmatpush1.bf16.msra.mxu0 %v1210_v10  ;;  %v1230_v9 = vpack.c.bf16 %v485_v8, %v483_v7  ;;  %v488_v10 = vld [vmem:[#allocation8 + $0x148] sm:$0xff] }
  0x9c   :  { %1171 = vmatpush1.bf16.msra.mxu1 %v1170_v12  ;;  %v467_v12 = vld [vmem:[#allocation8 + $0xa0] sm:$0xff]  ;;  %1213 = vmatprep.subr.bf16.mxu0 %v1212_v11  ;;  %v490_v11 = vld [vmem:[#allocation8 + $0x158] sm:$0xff] }
  0x9d   :  { %1173 = vmatprep.subr.bf16.mxu1 %v1172_v15  ;;  %v474_v15 = vld [vmem:[#allocation8 + $0xd8] sm:$0xff]  ;;  %v1214_v16 = vpack.c.bf16 %v469_v13, %v467_v12  ;;  %v1232_v12 = vpack.c.bf16 %v490_v11, %v488_v10  ;;  %v487_v13 = vld [vmem:[#allocation8 + $0x140] sm:$0xff]  ;;  %v646_v10 = vld [vmem:[#allocation10 + $0x70] sm:$0xff] }
  0x9e   :  { %v1216_v17 = vpack.c.bf16 %v474_v15, %v472_v14  ;;  %v489_v14 = vld [vmem:[#allocation8 + $0x150] sm:$0xff]  ;;  %v649_v11 = vld [vmem:[#allocation10 + $0x88] sm:$0xff] }
  0x9f   :  { %1215 = vmatpush1.bf16.msra.mxu0 %v1214_v16  ;;  %v1234_v15 = vpack.c.bf16 %v489_v14, %v487_v13  ;;  %v492_v16 = vld [vmem:[#allocation8 + $0x168] sm:$0xff] }
  0xa0   :  { %1175 = vmatpush1.bf16.msra.mxu1 %v1174_v18  ;;  %v471_v18 = vld [vmem:[#allocation8 + $0xc0] sm:$0xff]  ;;  %1217 = vmatprep.subr.bf16.mxu0 %v1216_v17  ;;  %v494_v17 = vld [vmem:[#allocation8 + $0x178] sm:$0xff] }
  0xa1   :  { %1177 = vmatprep.subr.bf16.mxu1 %v1176_v21  ;;  %v478_v21 = vld [vmem:[#allocation8 + $0xf8] sm:$0xff]  ;;  %v1218_v22 = vpack.c.bf16 %v473_v19, %v471_v18  ;;  %v1236_v18 = vpack.c.bf16 %v494_v17, %v492_v16  ;;  %v491_v19 = vld [vmem:[#allocation8 + $0x160] sm:$0xff]  ;;  %v650_v16 = vld [vmem:[#allocation10 + $0x90] sm:$0xff] }
  0xa2   :  { %v1220_v23 = vpack.c.bf16 %v478_v21, %v476_v20  ;;  %v493_v20 = vld [vmem:[#allocation8 + $0x170] sm:$0xff]  ;;  %v653_v17 = vld [vmem:[#allocation10 + $0xa8] sm:$0xff] }
  0xa3   :  { %1219 = vmatpush1.bf16.msra.mxu0 %v1218_v22  ;;  %v1238_v21 = vpack.c.bf16 %v493_v20, %v491_v19  ;;  %v496_v22 = vld [vmem:[#allocation8 + $0x188] sm:$0xff] }
  0xa4   :  { %1179 = vmatpush1.bf16.msra.mxu1 %v1178_v24  ;;  %1221 = vmatprep.subr.bf16.mxu0 %v1220_v23  ;;  %v140_v24 = vlaneseq  ;;  %v498_v23 = vld [vmem:[#allocation8 + $0x198] sm:$0xff] }
  0xa5   :  { %1181 = vmatprep.subr.bf16.mxu1 %v1180_v27  ;;  %v138_v27 = vld [vmem:[%s1966_s2] sm:$0x3] }
  0xa6   :  { %v141_v25 = vshrl.u32 %v140_v24, 7  ;;  %v1240_v24 = vpack.c.bf16 %v498_v23, %v496_v22  ;;  %v654_v22 = vld [vmem:[#allocation10 + $0xb0] sm:$0xff]  ;;  %v657_v23 = vld [vmem:[#allocation10 + $0xc8] sm:$0xff] }
  0xa7   :  { %1223 = vmatpush1.bf16.msra.mxu0 %v1222_v61  ;;  %v636_v61 = vld [vmem:[#allocation10 + $0x20] sm:$0xff] }
  0xa8   :  { %1183 = vmatpush1.bf16.msra.mxu1 %v1182_v30  ;;  %v1845_v26 = vsub.s32 0, %v141_v25  ;;  %v1850_v28 = vsub.s32 1, %v141_v25  ;;  %1225 = vmatprep.subr.bf16.mxu0 %v1224_v0  ;;  %v495_v25 = vld [vmem:[#allocation8 + $0x180] sm:$0xff]  ;;  %v643_v0 = vld [vmem:[#allocation10 + $0x58] sm:$0xff]  ;;  %v1262_v1 = vpack.c.bf16 %v638_v62, %v636_v61 }
  0xa9   :  { %1185 = vmatprep.subr.bf16.mxu1 %v1184_v33  ;;  %v1264_v2 = vpack.c.bf16 %v643_v0, %v641_v63 }
  0xaa   :  { %v143_v29 = vrot.slane %v138_v27, %v1845_v26  ;;  %v147_v30 = vrot.slane %v138_v27, %v1850_v28  ;;  %v497_v27 = vld [vmem:[#allocation8 + $0x190] sm:$0xff] }
  0xab   :  { %1227 = vmatpush1.bf16.msra.mxu0 %v1226_v3  ;;  %v640_v3 = vld [vmem:[#allocation10 + $0x40] sm:$0xff] }
  0xac   :  { %1187 = vmatpush1.bf16.msra.mxu1 %v1186_v36  ;;  %1229 = vmatprep.subr.bf16.mxu0 %v1228_v6  ;;  %v647_v6 = vld [vmem:[#allocation10 + $0x78] sm:$0xff]  ;;  %v1266_v7 = vpack.c.bf16 %v642_v4, %v640_v3 }
  0xad   :  { %1189 = vmatprep.subr.bf16.mxu1 %v1188_v39  ;;  %v1268_v8 = vpack.c.bf16 %v647_v6, %v645_v5 }
  0xaf   :  { %1231 = vmatpush1.bf16.msra.mxu0 %v1230_v9  ;;  %v644_v9 = vld [vmem:[#allocation10 + $0x60] sm:$0xff] }
  0xb0   :  { %1191 = vmatpush1.bf16.msra.mxu1 %v1190_v42  ;;  %1233 = vmatprep.subr.bf16.mxu0 %v1232_v12  ;;  %v651_v12 = vld [vmem:[#allocation10 + $0x98] sm:$0xff]  ;;  %v1270_v13 = vpack.c.bf16 %v646_v10, %v644_v9  ;;  %v662_v10 = vld [vmem:[#allocation10 + $0xf0] sm:$0xff] }
  0xb1   :  { %v1272_v14 = vpack.c.bf16 %v651_v12, %v649_v11  ;;  %v665_v11 = vld [vmem:[#allocation10 + $0x108] sm:$0xff]  ;;  %v667_v12 = vld [vmem:[#allocation10 + $0x118] sm:$0xff] }
  0xb3   :  { %1235 = vmatpush1.bf16.msra.mxu0 %v1234_v15  ;;  %v648_v15 = vld [vmem:[#allocation10 + $0x80] sm:$0xff] }
  0xb4   :  { %1237 = vmatprep.subr.bf16.mxu0 %v1236_v18  ;;  %v655_v18 = vld [vmem:[#allocation10 + $0xb8] sm:$0xff]  ;;  %v1274_v19 = vpack.c.bf16 %v650_v16, %v648_v15  ;;  %v666_v15 = vld [vmem:[#allocation10 + $0x110] sm:$0xff] }
  0xb5   :  { %v1276_v20 = vpack.c.bf16 %v655_v18, %v653_v17  ;;  %v671_v17 = vld [vmem:[#allocation10 + $0x138] sm:$0xff]  ;;  %v668_v18 = vld [vmem:[#allocation10 + $0x120] sm:$0xff] }
  0xb7   :  { %1239 = vmatpush1.bf16.msra.mxu0 %v1238_v21  ;;  %v652_v21 = vld [vmem:[#allocation10 + $0xa0] sm:$0xff] }
  0xb8   :  { %1241 = vmatprep.subr.bf16.mxu0 %v1240_v24  ;;  %v659_v24 = vld [vmem:[#allocation10 + $0xd8] sm:$0xff] }
 0x14a   :  { %v223_v31 = vpop.f32.mrb[0].mxu0 }
 0x14b   :  { %v224_v32 = vadd.f32 %v223_v31, %v143_v29  ;;  %v225_v33 = vpop.f32.mrb[1].mxu0  ;;  %v502_v31 = vld [vmem:[#allocation8 + $0x1b8] sm:$0xff] }
 0x14c   :  { %v226_v34 = vadd.f32 %v225_v33, %v147_v30  ;;  %v499_v33 = vld [vmem:[#allocation8 + $0x1a0] sm:$0xff] }
 0x14d   :  { %v1106_v35 = vmul.f32 -1.442695, %v224_v32 }
 0x14e   :  { %v1107_v36 = vmul.f32 -1.442695, %v226_v34  ;;  %v229_v37 = vpop.f32.mrb[2].mxu0 }
 0x14f   :  { %1397 = vpow2.f32 %v1106_v35  ;;  %v230_v38 = vadd.f32 %v229_v37, %v143_v29  ;;  %v231_v39 = vpop.f32.mrb[3].mxu0  ;;  %v1242_v29 = vpack.c.bf16 %v497_v27, %v495_v25  ;;  %v506_v37 = vld [vmem:[#allocation8 + $0x1d8] sm:$0xff]  ;;  %v1278_v25 = vpack.c.bf16 %v654_v22, %v652_v21  ;;  %v673_v21 = vld [vmem:[#allocation10 + $0x148] sm:$0xff] }
 0x150   :  { %1399 = vpow2.f32 %v1107_v36  ;;  %v232_v40 = vadd.f32 %v231_v39, %v147_v30  ;;  %v500_v30 = vld [vmem:[#allocation8 + $0x1a8] sm:$0xff]  ;;  %v503_v39 = vld [vmem:[#allocation8 + $0x1c0] sm:$0xff]  ;;  %v1280_v27 = vpack.c.bf16 %v659_v24, %v657_v23  ;;  %v675_v22 = vld [vmem:[#allocation10 + $0x158] sm:$0xff] }
 0x151   :  { %v1108_v41 = vmul.f32 -1.442695, %v230_v38  ;;  %1243 = vmatpush1.bf16.msra.mxu0 %v1242_v29  ;;  %v504_v36 = vld [vmem:[#allocation8 + $0x1c8] sm:$0xff]  ;;  %v656_v29 = vld [vmem:[#allocation10 + $0xc0] sm:$0xff]  ;;  %v1296_v23 = vpack.c.bf16 %v675_v22, %v673_v21  ;;  %v831_v21 = vld [vmem:[#allocation11 + $0x70] sm:$0xff] }
 0x152   :  { %v1109_v42 = vmul.f32 -1.442695, %v232_v40  ;;  %v672_v24 = vld [vmem:[#allocation10 + $0x140] sm:$0xff]  ;;  %v834_v22 = vld [vmem:[#allocation11 + $0x88] sm:$0xff] }
 0x153   :  { %1401 = vpow2.f32 %v1108_v41 }
 0x154   :  { %1403 = vpow2.f32 %v1109_v42  ;;  %v508_v42 = vld [vmem:[#allocation8 + $0x1e8] sm:$0xff] }
 0x159   :  { %v1398_v43 = vpop.eup %1397 }
 0x15a   :  { %v1400_v44 = vpop.eup %1399  ;;  %v246_v45 = vadd.f32 1.0, %v1398_v43  ;;  %v510_v43 = vld [vmem:[#allocation8 + $0x1f8] sm:$0xff] }
 0x15b   :  { %v247_v46 = vadd.f32 1.0, %v1400_v44  ;;  %v1252_v44 = vpack.c.bf16 %v510_v43, %v508_v42 }
 0x15c   :  { %1405 = vrcp.f32 %v246_v45  ;;  %v507_v45 = vld [vmem:[#allocation8 + $0x1e0] sm:$0xff] }
 0x15d   :  { %v1402_v47 = vpop.eup %1401  ;;  %1407 = vrcp.f32 %v247_v46  ;;  %v509_v46 = vld [vmem:[#allocation8 + $0x1f0] sm:$0xff] }
 0x15e   :  { %v1404_v48 = vpop.eup %1403  ;;  %v248_v49 = vadd.f32 1.0, %v1402_v47  ;;  %v1254_v47 = vpack.c.bf16 %v509_v46, %v507_v45 }
 0x15f   :  { %v249_v50 = vadd.f32 1.0, %v1404_v48  ;;  %v633_v48 = vld [vmem:[#allocation10 + $0x8] sm:$0xff] }
 0x160   :  { %1409 = vrcp.f32 %v248_v49  ;;  %v635_v49 = vld [vmem:[#allocation10 + $0x18] sm:$0xff] }
 0x161   :  { %1411 = vrcp.f32 %v249_v50  ;;  %v632_v50 = vld [vmem:[#allocation10] sm:$0xff] }
 0x166   :  { %v1406_v51 = vpop.eup %1405 }
 0x167   :  { %v1408_v52 = vpop.eup %1407  ;;  %v1856_v54 = vmul.f32 %v1406_v51, %v224_v32  ;;  %v1244_v32 = vpack.c.bf16 %v502_v31, %v500_v30  ;;  %v1256_v51 = vpack.c.bf16 %v635_v49, %v633_v48  ;;  %v658_v30 = vld [vmem:[#allocation10 + $0xd0] sm:$0xff]  ;;  %v661_v31 = vld [vmem:[#allocation10 + $0xe8] sm:$0xff] }
 0x168   :  { %v1854_v53 = vmul.f32 %v1408_v52, %v226_v34  ;;  %v501_v34 = vld [vmem:[#allocation8 + $0x1b0] sm:$0xff] }
 0x169   :  { %v1246_v35 = vpack.c.bf16 %v501_v34, %v499_v33  ;;  %1245 = vmatprep.subr.bf16.mxu0 %v1244_v32  ;;  %v634_v52 = vld [vmem:[#allocation10 + $0x10] sm:$0xff]  ;;  %1257 = vmatprep.subr.bf16.mxu1 %v1256_v51  ;;  %v663_v32 = vld [vmem:[#allocation10 + $0xf8] sm:$0xff]  ;;  %v1282_v33 = vpack.c.bf16 %v658_v30, %v656_v29  ;;  %v677_v29 = vld [vmem:[#allocation10 + $0x168] sm:$0xff] }
 0x16a   :  { %v1410_v55 = vpop.eup %1409  ;;  %402 = vmatprep.mubr.f32.mxu1 %v1854_v53  ;;  %v1258_v59 = vpack.c.bf16 %v634_v52, %v632_v50  ;;  %v1284_v34 = vpack.c.bf16 %v663_v32, %v661_v31  ;;  %v679_v30 = vld [vmem:[#allocation10 + $0x178] sm:$0xff]  ;;  %v676_v32 = vld [vmem:[#allocation10 + $0x160] sm:$0xff] }
 0x16b   :  { %v1412_v56 = vpop.eup %1411  ;;  %403 = vmatmul.mubr.f32.vlgmr.msra.gmra.mrb[0].mxu1 %v1856_v54  ;;  %v1862_v58 = vmul.f32 %v1410_v55, %v230_v38  ;;  %1247 = vmatpush1.bf16.msra.mxu0 %v1246_v35  ;;  %v1248_v38 = vpack.c.bf16 %v506_v37, %v504_v36  ;;  %v637_v55 = vld [vmem:[#allocation10 + $0x28] sm:$0xff]  ;;  %v326_v35 = vld [vmem:[%s1968_s4] sm:$0x3]  ;;  %v1300_v31 = vpack.c.bf16 %v679_v30, %v677_v29  ;;  %v835_v29 = vld [vmem:[#allocation11 + $0x90] sm:$0xff] }
 0x16c   :  { %v1860_v57 = vmul.f32 %v1412_v56, %v232_v40  ;;  %v505_v40 = vld [vmem:[#allocation8 + $0x1d0] sm:$0xff]  ;;  %v639_v56 = vld [vmem:[#allocation10 + $0x38] sm:$0xff]  ;;  %1259 = vmatpush1.bf16.msra.mxu1 %v1258_v59  ;;  %v331_v36 = vrot.slane %v326_v35, %v1845_v26  ;;  %v335_v37 = vrot.slane %v326_v35, %v1850_v28  ;;  %v681_v35 = vld [vmem:[#allocation10 + $0x188] sm:$0xff] }
 0x16d   :  { %v1250_v41 = vpack.c.bf16 %v505_v40, %v503_v39  ;;  %1249 = vmatprep.subr.bf16.mxu0 %v1248_v38  ;;  %v1260_v60 = vpack.c.bf16 %v639_v56, %v637_v55  ;;  %v838_v30 = vld [vmem:[#allocation11 + $0xa8] sm:$0xff] }
 0x16e   :  { %408 = vmatprep.mubr.f32.mxu1 %v1860_v57 }
 0x16f   :  { %409 = vmatmul.mubr.f32.gmra.mrb[2].mxu1 %v1862_v58  ;;  %1251 = vmatpush1.bf16.msra.mxu0 %v1250_v41 }
 0x170   :  { %1253 = vmatprep.subr.bf16.mxu0 %v1252_v44  ;;  %1261 = vmatprep.subr.bf16.mxu1 %v1260_v60 }
 0x171   :  { %1263 = vmatpush1.bf16.msra.mxu1 %v1262_v1 }
 0x172   :  { %1265 = vmatprep.subr.bf16.mxu1 %v1264_v2 }
 0x173   :  { %1255 = vmatpush1.bf16.msra.mxu0 %v1254_v47 }
 0x175   :  { %1267 = vmatpush1.bf16.msra.mxu1 %v1266_v7 }
 0x176   :  { %1269 = vmatprep.subr.bf16.mxu1 %v1268_v8 }
 0x179   :  { %1271 = vmatpush1.bf16.msra.mxu1 %v1270_v13  ;;  %v1288_v13 = vpack.c.bf16 %v667_v12, %v665_v11  ;;  %v823_v11 = vld [vmem:[#allocation11 + $0x30] sm:$0xff]  ;;  %v826_v12 = vld [vmem:[#allocation11 + $0x48] sm:$0xff] }
 0x17a   :  { %1273 = vmatprep.subr.bf16.mxu1 %v1272_v14  ;;  %v664_v14 = vld [vmem:[#allocation10 + $0x100] sm:$0xff] }
 0x17b   :  { %v1290_v16 = vpack.c.bf16 %v666_v15, %v664_v14 }
 0x17d   :  { %1275 = vmatpush1.bf16.msra.mxu1 %v1274_v19  ;;  %v670_v19 = vld [vmem:[#allocation10 + $0x130] sm:$0xff] }
 0x17e   :  { %1277 = vmatprep.subr.bf16.mxu1 %v1276_v20  ;;  %v1294_v20 = vpack.c.bf16 %v670_v19, %v668_v18 }
 0x181   :  { %1279 = vmatpush1.bf16.msra.mxu1 %v1278_v25  ;;  %v674_v25 = vld [vmem:[#allocation10 + $0x150] sm:$0xff] }
 0x182   :  { %1281 = vmatprep.subr.bf16.mxu1 %v1280_v27  ;;  %v1298_v27 = vpack.c.bf16 %v674_v25, %v672_v24 }
 0x185   :  { %1283 = vmatpush1.bf16.msra.mxu1 %v1282_v33  ;;  %v678_v33 = vld [vmem:[#allocation10 + $0x170] sm:$0xff] }
 0x186   :  { %1285 = vmatprep.subr.bf16.mxu1 %v1284_v34  ;;  %v1302_v34 = vpack.c.bf16 %v678_v33, %v676_v32 }
 0x23e   :  { %v404_v38 = vpop.f32.mrb[0].mxu1 }
 0x23f   :  { %v405_v39 = vadd.f32 %v404_v38, %v331_v36  ;;  %v406_v40 = vpop.f32.mrb[1].mxu1  ;;  %v680_v38 = vld [vmem:[#allocation10 + $0x180] sm:$0xff] }
 0x240   :  { %v407_v41 = vadd.f32 %v406_v40, %v335_v37 }
 0x241   :  { %v1110_v42 = vmul.f32 -1.442695, %v405_v39 }
 0x242   :  { %v1111_v43 = vmul.f32 -1.442695, %v407_v41  ;;  %v410_v44 = vpop.f32.mrb[2].mxu1 }
 0x243   :  { %1413 = vpow2.f32 %v1110_v42  ;;  %v411_v45 = vadd.f32 %v410_v44, %v331_v36  ;;  %v412_v46 = vpop.f32.mrb[3].mxu1  ;;  %v683_v36 = vld [vmem:[#allocation10 + $0x198] sm:$0xff]  ;;  %v684_v44 = vld [vmem:[#allocation10 + $0x1a0] sm:$0xff] }
 0x244   :  { %1415 = vpow2.f32 %v1111_v43  ;;  %v413_v47 = vadd.f32 %v412_v46, %v335_v37  ;;  %v1304_v37 = vpack.c.bf16 %v683_v36, %v681_v35  ;;  %v687_v42 = vld [vmem:[#allocation10 + $0x1b8] sm:$0xff]  ;;  %v839_v35 = vld [vmem:[#allocation11 + $0xb0] sm:$0xff]  ;;  %v842_v36 = vld [vmem:[#allocation11 + $0xc8] sm:$0xff] }
 0x245   :  { %v1112_v48 = vmul.f32 -1.442695, %v411_v45 }
 0x246   :  { %v1113_v49 = vmul.f32 -1.442695, %v413_v47 }
 0x247   :  { %1417 = vpow2.f32 %v1112_v48  ;;  %v691_v48 = vld [vmem:[#allocation10 + $0x1d8] sm:$0xff] }
 0x248   :  { %1419 = vpow2.f32 %v1113_v49 }
 0x24d   :  { %v1414_v50 = vpop.eup %1413 }
 0x24e   :  { %v1416_v51 = vpop.eup %1415  ;;  %v427_v52 = vadd.f32 1.0, %v1414_v50  ;;  %v688_v50 = vld [vmem:[#allocation10 + $0x1c0] sm:$0xff] }
 0x24f   :  { %v428_v55 = vadd.f32 1.0, %v1416_v51  ;;  %v690_v51 = vld [vmem:[#allocation10 + $0x1d0] sm:$0xff] }
 0x250   :  { %1421 = vrcp.f32 %v427_v52  ;;  %v1314_v52 = vpack.c.bf16 %v690_v51, %v688_v50 }
 0x251   :  { %v1418_v56 = vpop.eup %1417  ;;  %1423 = vrcp.f32 %v428_v55  ;;  %v693_v55 = vld [vmem:[#allocation10 + $0x1e8] sm:$0xff] }
 0x252   :  { %v1420_v59 = vpop.eup %1419  ;;  %v429_v60 = vadd.f32 1.0, %v1418_v56  ;;  %v695_v56 = vld [vmem:[#allocation10 + $0x1f8] sm:$0xff] }
 0x253   :  { %v430_v61 = vadd.f32 1.0, %v1420_v59  ;;  %v1316_v59 = vpack.c.bf16 %v695_v56, %v693_v55 }
 0x254   :  { %1425 = vrcp.f32 %v429_v60  ;;  %v692_v60 = vld [vmem:[#allocation10 + $0x1e0] sm:$0xff] }
 0x255   :  { %1427 = vrcp.f32 %v430_v61  ;;  %v694_v61 = vld [vmem:[#allocation10 + $0x1f0] sm:$0xff] }
 0x25a   :  { %v1422_v62 = vpop.eup %1421 }
 0x25b   :  { %v1424_v63 = vpop.eup %1423  ;;  %v439_v0 = vmul.f32 %v1422_v62, %v405_v39  ;;  %v682_v39 = vld [vmem:[#allocation10 + $0x190] sm:$0xff]  ;;  %v1318_v62 = vpack.c.bf16 %v694_v61, %v692_v60 }
 0x25c   :  { %v440_v1 = vmul.f32 %v1424_v63, %v407_v41  ;;  %v1306_v40 = vpack.c.bf16 %v682_v39, %v680_v38  ;;  %v685_v41 = vld [vmem:[#allocation10 + $0x1a8] sm:$0xff] }
 0x25d   :  { %v1875_v5 = vadd.f32 %v439_v0, %v1856_v54  ;;  %v1308_v43 = vpack.c.bf16 %v687_v42, %v685_v41  ;;  %v818_v63 = vld [vmem:[#allocation11 + $0x8] sm:$0xff]  ;;  %v820_v0 = vld [vmem:[#allocation11 + $0x18] sm:$0xff]  ;;  %v843_v41 = vld [vmem:[#allocation11 + $0xd0] sm:$0xff] }
 0x25e   :  { %v1426_v2 = vpop.eup %1425  ;;  %v1872_v3 = vadd.f32 %v440_v1, %v1854_v53  ;;  %v660_v53 = vld [vmem:[#allocation10 + $0xe0] sm:$0xff]  ;;  %v846_v42 = vld [vmem:[#allocation11 + $0xe8] sm:$0xff] }
 0x25f   :  { %v1428_v4 = vpop.eup %1427  ;;  %v441_v6 = vmul.f32 %v1426_v2, %v411_v45  ;;  %v1286_v54 = vpack.c.bf16 %v662_v10, %v660_v53  ;;  %v686_v45 = vld [vmem:[#allocation10 + $0x1b0] sm:$0xff]  ;;  %v817_v1 = vld [vmem:[#allocation11] sm:$0xff]  ;;  %v1320_v2 = vpack.c.bf16 %v820_v0, %v818_v63 }
 0x260   :  { %v442_v7 = vmul.f32 %v1428_v4, %v413_v47  ;;  %587 = vmatprep.mubr.f32.mxu0 %v1872_v3  ;;  %v1310_v46 = vpack.c.bf16 %v686_v45, %v684_v44  ;;  %v689_v47 = vld [vmem:[#allocation10 + $0x1c8] sm:$0xff]  ;;  %v819_v4 = vld [vmem:[#allocation11 + $0x10] sm:$0xff] }
 0x261   :  { %588 = vmatmul.mubr.f32.vlgmr.msra.gmra.mrb[4].mxu0 %v1875_v5  ;;  %v1883_v9 = vadd.f32 %v441_v6, %v1862_v58  ;;  %1287 = vmatpush1.bf16.msra.mxu1 %v1286_v54  ;;  %v1312_v49 = vpack.c.bf16 %v691_v48, %v689_v47  ;;  %v822_v6 = vld [vmem:[#allocation11 + $0x28] sm:$0xff]  ;;  %v1322_v53 = vpack.c.bf16 %v819_v4, %v817_v1  ;;  %v821_v54 = vld [vmem:[#allocation11 + $0x20] sm:$0xff] }
 0x262   :  { %v1880_v8 = vadd.f32 %v442_v7, %v1860_v57  ;;  %1289 = vmatprep.subr.bf16.mxu1 %v1288_v13  ;;  %v669_v57 = vld [vmem:[#allocation10 + $0x128] sm:$0xff]  ;;  %v824_v7 = vld [vmem:[#allocation11 + $0x38] sm:$0xff]  ;;  %1321 = vmatprep.subr.bf16.mxu0 %v1320_v2  ;;  %v1326_v14 = vpack.c.bf16 %v823_v11, %v821_v54 }
 0x263   :  { %v1292_v58 = vpack.c.bf16 %v671_v17, %v669_v57  ;;  %v1324_v10 = vpack.c.bf16 %v824_v7, %v822_v6  ;;  %v828_v13 = vld [vmem:[#allocation11 + $0x58] sm:$0xff]  ;;  %1323 = vmatpush1.bf16.msra.mxu0 %v1322_v53  ;;  %v827_v57 = vld [vmem:[#allocation11 + $0x50] sm:$0xff]  ;;  %v830_v17 = vld [vmem:[#allocation11 + $0x68] sm:$0xff] }
 0x264   :  { %593 = vmatprep.mubr.f32.mxu0 %v1880_v8  ;;  %v1328_v15 = vpack.c.bf16 %v828_v13, %v826_v12 }
 0x265   :  { %594 = vmatmul.mubr.f32.gmra.mrb[6].mxu0 %v1883_v9  ;;  %1291 = vmatpush1.bf16.msra.mxu1 %v1290_v16  ;;  %v825_v16 = vld [vmem:[#allocation11 + $0x40] sm:$0xff] }
 0x266   :  { %1293 = vmatprep.subr.bf16.mxu1 %v1292_v58  ;;  %1325 = vmatprep.subr.bf16.mxu0 %v1324_v10  ;;  %v832_v58 = vld [vmem:[#allocation11 + $0x78] sm:$0xff]  ;;  %v1330_v18 = vpack.c.bf16 %v827_v57, %v825_v16 }
 0x267   :  { %1327 = vmatpush1.bf16.msra.mxu0 %v1326_v14  ;;  %v1332_v19 = vpack.c.bf16 %v832_v58, %v830_v17 }
 0x268   :  { %1329 = vmatprep.subr.bf16.mxu0 %v1328_v15 }
 0x269   :  { %1295 = vmatpush1.bf16.msra.mxu1 %v1294_v20  ;;  %v829_v20 = vld [vmem:[#allocation11 + $0x60] sm:$0xff] }
 0x26a   :  { %1297 = vmatprep.subr.bf16.mxu1 %v1296_v23  ;;  %v836_v23 = vld [vmem:[#allocation11 + $0x98] sm:$0xff]  ;;  %v1334_v24 = vpack.c.bf16 %v831_v21, %v829_v20  ;;  %v847_v21 = vld [vmem:[#allocation11 + $0xf0] sm:$0xff] }
 0x26b   :  { %1331 = vmatpush1.bf16.msra.mxu0 %v1330_v18  ;;  %v1336_v25 = vpack.c.bf16 %v836_v23, %v834_v22  ;;  %v850_v22 = vld [vmem:[#allocation11 + $0x108] sm:$0xff]  ;;  %v852_v23 = vld [vmem:[#allocation11 + $0x118] sm:$0xff] }
 0x26c   :  { %1333 = vmatprep.subr.bf16.mxu0 %v1332_v19 }
 0x26d   :  { %1299 = vmatpush1.bf16.msra.mxu1 %v1298_v27  ;;  %v833_v27 = vld [vmem:[#allocation11 + $0x80] sm:$0xff] }
 0x26e   :  { %1301 = vmatprep.subr.bf16.mxu1 %v1300_v31  ;;  %v840_v31 = vld [vmem:[#allocation11 + $0xb8] sm:$0xff]  ;;  %v1338_v32 = vpack.c.bf16 %v835_v29, %v833_v27  ;;  %v851_v27 = vld [vmem:[#allocation11 + $0x110] sm:$0xff] }
 0x26f   :  { %1335 = vmatpush1.bf16.msra.mxu0 %v1334_v24  ;;  %v1340_v33 = vpack.c.bf16 %v840_v31, %v838_v30  ;;  %v1352_v24 = vpack.c.bf16 %v852_v23, %v850_v22  ;;  %v856_v30 = vld [vmem:[#allocation11 + $0x138] sm:$0xff]  ;;  %v853_v31 = vld [vmem:[#allocation11 + $0x120] sm:$0xff] }
 0x270   :  { %1337 = vmatprep.subr.bf16.mxu0 %v1336_v25  ;;  %v849_v25 = vld [vmem:[#allocation11 + $0x100] sm:$0xff] }
 0x271   :  { %1303 = vmatpush1.bf16.msra.mxu1 %v1302_v34  ;;  %v837_v34 = vld [vmem:[#allocation11 + $0xa0] sm:$0xff]  ;;  %v1354_v29 = vpack.c.bf16 %v851_v27, %v849_v25 }
 0x272   :  { %1305 = vmatprep.subr.bf16.mxu1 %v1304_v37  ;;  %v844_v37 = vld [vmem:[#allocation11 + $0xd8] sm:$0xff]  ;;  %v1342_v38 = vpack.c.bf16 %v839_v35, %v837_v34  ;;  %v858_v34 = vld [vmem:[#allocation11 + $0x148] sm:$0xff] }
 0x273   :  { %1339 = vmatpush1.bf16.msra.mxu0 %v1338_v32  ;;  %v1344_v39 = vpack.c.bf16 %v844_v37, %v842_v36  ;;  %v855_v32 = vld [vmem:[#allocation11 + $0x130] sm:$0xff]  ;;  %v860_v35 = vld [vmem:[#allocation11 + $0x158] sm:$0xff]  ;;  %v857_v37 = vld [vmem:[#allocation11 + $0x140] sm:$0xff] }
 0x274   :  { %1341 = vmatprep.subr.bf16.mxu0 %v1340_v33  ;;  %v1358_v33 = vpack.c.bf16 %v855_v32, %v853_v31  ;;  %v1360_v36 = vpack.c.bf16 %v860_v35, %v858_v34 }
 0x275   :  { %1307 = vmatpush1.bf16.msra.mxu1 %v1306_v40  ;;  %v841_v40 = vld [vmem:[#allocation11 + $0xc0] sm:$0xff] }
 0x276   :  { %1309 = vmatprep.subr.bf16.mxu1 %v1308_v43  ;;  %v848_v43 = vld [vmem:[#allocation11 + $0xf8] sm:$0xff]  ;;  %v1346_v44 = vpack.c.bf16 %v843_v41, %v841_v40  ;;  %v862_v40 = vld [vmem:[#allocation11 + $0x168] sm:$0xff] }
 0x277   :  { %1343 = vmatpush1.bf16.msra.mxu0 %v1342_v38  ;;  %v1348_v45 = vpack.c.bf16 %v848_v43, %v846_v42  ;;  %v859_v38 = vld [vmem:[#allocation11 + $0x150] sm:$0xff]  ;;  %v864_v41 = vld [vmem:[#allocation11 + $0x178] sm:$0xff]  ;;  %v861_v43 = vld [vmem:[#allocation11 + $0x160] sm:$0xff] }
 0x278   :  { %1345 = vmatprep.subr.bf16.mxu0 %v1344_v39  ;;  %v1362_v39 = vpack.c.bf16 %v859_v38, %v857_v37  ;;  %v1364_v42 = vpack.c.bf16 %v864_v41, %v862_v40 }
 0x279   :  { %1311 = vmatpush1.bf16.msra.mxu1 %v1310_v46  ;;  %v511_v46 = vld [vmem:[%s1970_s6] sm:$0x3] }
 0x27a   :  { %1313 = vmatprep.subr.bf16.mxu1 %v1312_v49  ;;  %v516_v47 = vrot.slane %v511_v46, %v1845_v26  ;;  %v520_v48 = vrot.slane %v511_v46, %v1850_v28  ;;  %v866_v46 = vld [vmem:[#allocation11 + $0x188] sm:$0xff] }
 0x27b   :  { %1347 = vmatpush1.bf16.msra.mxu0 %v1346_v44  ;;  %v863_v44 = vld [vmem:[#allocation11 + $0x170] sm:$0xff] }
 0x27c   :  { %1349 = vmatprep.subr.bf16.mxu0 %v1348_v45  ;;  %v1366_v45 = vpack.c.bf16 %v863_v44, %v861_v43 }
 0x27d   :  { %1315 = vmatpush1.bf16.msra.mxu1 %v1314_v52 }
 0x27e   :  { %1317 = vmatprep.subr.bf16.mxu1 %v1316_v59 }
 0x281   :  { %1319 = vmatpush1.bf16.msra.mxu1 %v1318_v62 }
 0x334   :  { %v589_v49 = vpop.f32.mrb[4].mxu0 }
 0x335   :  { %v590_v50 = vadd.f32 %v589_v49, %v516_v47  ;;  %v591_v51 = vpop.f32.mrb[5].mxu0  ;;  %v865_v49 = vld [vmem:[#allocation11 + $0x180] sm:$0xff] }
 0x336   :  { %v592_v52 = vadd.f32 %v591_v51, %v520_v48 }
 0x337   :  { %v1114_v55 = vmul.f32 -1.442695, %v590_v50 }
 0x338   :  { %v1115_v56 = vmul.f32 -1.442695, %v592_v52  ;;  %v595_v59 = vpop.f32.mrb[6].mxu0 }
 0x339   :  { %1429 = vpow2.f32 %v1114_v55  ;;  %v596_v60 = vadd.f32 %v595_v59, %v516_v47  ;;  %v597_v61 = vpop.f32.mrb[7].mxu0  ;;  %v868_v47 = vld [vmem:[#allocation11 + $0x198] sm:$0xff]  ;;  %v869_v59 = vld [vmem:[#allocation11 + $0x1a0] sm:$0xff] }
 0x33a   :  { %1431 = vpow2.f32 %v1115_v56  ;;  %v598_v62 = vadd.f32 %v597_v61, %v520_v48  ;;  %v1368_v48 = vpack.c.bf16 %v868_v47, %v866_v46  ;;  %v872_v55 = vld [vmem:[#allocation11 + $0x1b8] sm:$0xff]  ;;  %v881_v47 = vld [vmem:[%s1974_s10] sm:$0x3]  ;;  %s1609_s10 = scalar_lea.vmem %s1074_s20, 256 }
 0x33b   :  { %v1116_v63 = vmul.f32 -1.442695, %v596_v60  ;;  %p1610_p6 = scmp.ne.s32.totalorder %s1074_s20, %s1609_s10  ;;  %p1615_p8 = scmp.lt.s32.totalorder %s1609_s10, %s1609_s10 }
 0x33c   :  { %v1117_v0 = vmul.f32 -1.442695, %v598_v62 }
 0x33d   :  { %1433 = vpow2.f32 %v1116_v63  ;;  %v876_v63 = vld [vmem:[#allocation11 + $0x1d8] sm:$0xff]  ;;  %p1616_p9 = por %p1615_p8, %p1614_p7 }
 0x33e   :  { %1435 = vpow2.f32 %v1117_v0 }
 0x33f   :  { %p1617_p10 = pnand %p1616_p9, %p1610_p6 }
 0x343   :  { %v1430_v1 = vpop.eup %1429 }
 0x344   :  { %v1432_v2 = vpop.eup %1431  ;;  %v612_v4 = vadd.f32 1.0, %v1430_v1  ;;  %v873_v1 = vld [vmem:[#allocation11 + $0x1c0] sm:$0xff] }
 0x345   :  { %v613_v6 = vadd.f32 1.0, %v1432_v2  ;;  %v875_v2 = vld [vmem:[#allocation11 + $0x1d0] sm:$0xff] }
 0x346   :  { %1437 = vrcp.f32 %v612_v4  ;;  %v1378_v4 = vpack.c.bf16 %v875_v2, %v873_v1 }
 0x347   :  { %v1434_v7 = vpop.eup %1433  ;;  %1439 = vrcp.f32 %v613_v6  ;;  %v878_v6 = vld [vmem:[#allocation11 + $0x1e8] sm:$0xff] }
 0x348   :  { %v1436_v53 = vpop.eup %1435  ;;  %v614_v10 = vadd.f32 1.0, %v1434_v7  ;;  %v880_v7 = vld [vmem:[#allocation11 + $0x1f8] sm:$0xff] }
 0x349   :  { %v615_v54 = vadd.f32 1.0, %v1436_v53  ;;  %v1380_v53 = vpack.c.bf16 %v880_v7, %v878_v6 }
 0x34a   :  { %1441 = vrcp.f32 %v614_v10  ;;  %v877_v10 = vld [vmem:[#allocation11 + $0x1e0] sm:$0xff] }
 0x34b   :  { %1443 = vrcp.f32 %v615_v54  ;;  %v879_v54 = vld [vmem:[#allocation11 + $0x1f0] sm:$0xff] }
 0x350   :  { %v1438_v11 = vpop.eup %1437 }
 0x351   :  { %v1440_v12 = vpop.eup %1439  ;;  %v624_v13 = vmul.f32 %v1438_v11, %v590_v50  ;;  %v867_v50 = vld [vmem:[#allocation11 + $0x190] sm:$0xff]  ;;  %v1382_v11 = vpack.c.bf16 %v879_v54, %v877_v10 }
 0x352   :  { %v625_v14 = vmul.f32 %v1440_v12, %v592_v52  ;;  %v1370_v51 = vpack.c.bf16 %v867_v50, %v865_v49  ;;  %v870_v52 = vld [vmem:[#allocation11 + $0x1a8] sm:$0xff]  ;;  %v696_v12 = vld [vmem:[%s1972_s8] sm:$0x3] }
 0x353   :  { %v1896_v17 = vadd.f32 %v624_v13, %v1875_v5  ;;  %v1372_v56 = vpack.c.bf16 %v872_v55, %v870_v52  ;;  %v701_v13 = vrot.slane %v696_v12, %v1845_v26 }
 0x354   :  { %v1442_v15 = vpop.eup %1441  ;;  %v1893_v16 = vadd.f32 %v625_v14, %v1872_v3  ;;  %v845_v3 = vld [vmem:[#allocation11 + $0xe0] sm:$0xff]  ;;  %v705_v14 = vrot.slane %v696_v12, %v1850_v28 }
 0x355   :  { %v1444_v57 = vpop.eup %1443  ;;  %v626_v58 = vmul.f32 %v1442_v15, %v596_v60  ;;  %v1350_v5 = vpack.c.bf16 %v847_v21, %v845_v3  ;;  %v871_v60 = vld [vmem:[#allocation11 + $0x1b0] sm:$0xff] }
 0x356   :  { %v627_v18 = vmul.f32 %v1444_v57, %v598_v62  ;;  %772 = vmatprep.mubr.f32.mxu1 %v1893_v16  ;;  %v1374_v61 = vpack.c.bf16 %v871_v60, %v869_v59  ;;  %v874_v62 = vld [vmem:[#allocation11 + $0x1c8] sm:$0xff] }
 0x357   :  { %773 = vmatmul.mubr.f32.vlgmr.msra.gmra.mrb[4].mxu1 %v1896_v17  ;;  %v1904_v20 = vadd.f32 %v626_v58, %v1883_v9  ;;  %1351 = vmatpush1.bf16.msra.mxu0 %v1350_v5  ;;  %v1376_v0 = vpack.c.bf16 %v876_v63, %v874_v62 }
 0x358   :  { %v1901_v19 = vadd.f32 %v627_v18, %v1880_v8  ;;  %1353 = vmatprep.subr.bf16.mxu0 %v1352_v24  ;;  %v854_v8 = vld [vmem:[#allocation11 + $0x128] sm:$0xff] }
 0x359   :  { %v1356_v9 = vpack.c.bf16 %v856_v30, %v854_v8 }
 0x35a   :  { %778 = vmatprep.mubr.f32.mxu1 %v1901_v19 }
 0x35b   :  { %779 = vmatmul.mubr.f32.gmra.mrb[6].mxu1 %v1904_v20  ;;  %1355 = vmatpush1.bf16.msra.mxu0 %v1354_v29 }
 0x35c   :  { %1357 = vmatprep.subr.bf16.mxu0 %v1356_v9 }
 0x35f   :  { %1359 = vmatpush1.bf16.msra.mxu0 %v1358_v33 }
 0x360   :  { %1361 = vmatprep.subr.bf16.mxu0 %v1360_v36 }
 0x363   :  { %1363 = vmatpush1.bf16.msra.mxu0 %v1362_v39 }
 0x364   :  { %1365 = vmatprep.subr.bf16.mxu0 %v1364_v42 }
 0x367   :  { %1367 = vmatpush1.bf16.msra.mxu0 %v1366_v45 }
 0x368   :  { %1369 = vmatprep.subr.bf16.mxu0 %v1368_v48  ;;  %v886_v48 = vrot.slane %v881_v47, %v1845_v26 }
 0x36b   :  { %1371 = vmatpush1.bf16.msra.mxu0 %v1370_v51  ;;  %v1925_v51 = vld [vmem:[%s1976_s12] ss:$0 sm:$0xff] }
 0x36c   :  { %1373 = vmatprep.subr.bf16.mxu0 %v1372_v56 }
 0x36f   :  { %1375 = vmatpush1.bf16.msra.mxu0 %v1374_v61 }
 0x370   :  { %1377 = vmatprep.subr.bf16.mxu0 %v1376_v0 }
 0x373   :  { %1379 = vmatpush1.bf16.msra.mxu0 %v1378_v4 }
 0x374   :  { %1381 = vmatprep.subr.bf16.mxu0 %v1380_v53 }
 0x377   :  { %1383 = vmatpush1.bf16.msra.mxu0 %v1382_v11 }
 0x42a   :  { %v774_v15 = vpop.f32.mrb[4].mxu1 }
 0x42b   :  { %v775_v57 = vadd.f32 %v774_v15, %v701_v13  ;;  %v776_v58 = vpop.f32.mrb[5].mxu1 }
 0x42c   :  { %v777_v18 = vadd.f32 %v776_v58, %v705_v14 }
 0x42d   :  { %v1118_v3 = vmul.f32 -1.442695, %v775_v57 }
 0x42e   :  { %v1119_v21 = vmul.f32 -1.442695, %v777_v18  ;;  %v780_v5 = vpop.f32.mrb[6].mxu1 }
 0x42f   :  { %1445 = vpow2.f32 %v1118_v3  ;;  %v781_v22 = vadd.f32 %v780_v5, %v701_v13  ;;  %v782_v23 = vpop.f32.mrb[7].mxu1 }
 0x430   :  { %1447 = vpow2.f32 %v1119_v21  ;;  %v783_v24 = vadd.f32 %v782_v23, %v705_v14 }
 0x431   :  { %v1120_v25 = vmul.f32 -1.442695, %v781_v22 }
 0x432   :  { %v1121_v27 = vmul.f32 -1.442695, %v783_v24 }
 0x433   :  { %1449 = vpow2.f32 %v1120_v25 }
 0x434   :  { %1451 = vpow2.f32 %v1121_v27 }
 0x439   :  { %v1446_v29 = vpop.eup %1445 }
 0x43a   :  { %v1448_v8 = vpop.eup %1447  ;;  %v797_v30 = vadd.f32 1.0, %v1446_v29 }
 0x43b   :  { %v798_v9 = vadd.f32 1.0, %v1448_v8 }
 0x43c   :  { %1453 = vrcp.f32 %v797_v30 }
 0x43d   :  { %v1450_v31 = vpop.eup %1449  ;;  %1455 = vrcp.f32 %v798_v9 }
 0x43e   :  { %v1452_v32 = vpop.eup %1451  ;;  %v799_v33 = vadd.f32 1.0, %v1450_v31 }
 0x43f   :  { %v800_v34 = vadd.f32 1.0, %v1452_v32 }
 0x440   :  { %1457 = vrcp.f32 %v799_v33 }
 0x441   :  { %1459 = vrcp.f32 %v800_v34 }
 0x446   :  { %v1454_v35 = vpop.eup %1453 }
 0x447   :  { %v1456_v36 = vpop.eup %1455  ;;  %v809_v37 = vmul.f32 %v1454_v35, %v775_v57 }
 0x448   :  { %v810_v38 = vmul.f32 %v1456_v36, %v777_v18 }
 0x449   :  { %v813_v42 = vadd.f32 %v809_v37, %v1896_v17 }
 0x44a   :  { %v1458_v39 = vpop.eup %1457  ;;  %v814_v40 = vadd.f32 %v810_v38, %v1893_v16  ;;  %v890_v16 = vrot.slane %v881_v47, %v1850_v28 }
 0x44b   :  { %v1460_v41 = vpop.eup %1459  ;;  %v811_v43 = vmul.f32 %v1458_v39, %v781_v22 }
 0x44c   :  { %v812_v44 = vmul.f32 %v1460_v41, %v783_v24  ;;  %957 = vmatprep.mubr.f32.mxu0 %v814_v40 }
 0x44d   :  { %958 = vmatmul.mubr.f32.vlgmr.msra.gmra.mrb[8].mxu0 %v813_v42  ;;  %v815_v46 = vadd.f32 %v811_v43, %v1904_v20 }
 0x44e   :  { %v816_v45 = vadd.f32 %v812_v44, %v1901_v19 }
 0x450   :  { %963 = vmatprep.mubr.f32.mxu0 %v816_v45 }
 0x451   :  { %964 = vmatmul.mubr.f32.gmra.mrb[10].mxu0 %v815_v46 }
 0x520   :  { %v959_v49 = vpop.f32.mrb[8].mxu0 }
 0x521   :  { %v960_v17 = vadd.f32 %v959_v49, %v886_v48  ;;  %v961_v50 = vpop.f32.mrb[9].mxu0 }
 0x522   :  { %v962_v19 = vadd.f32 %v961_v50, %v890_v16 }
 0x523   :  { %1064 = vst [vmem:[#allocation13] sm:$0xff] %v960_v17 }
 0x524   :  { %v978_v20 = vsub.f32 %v1925_v51, %v962_v19  ;;  %v965_v52 = vpop.f32.mrb[10].mxu0 }
 0x525   :  { %v966_v55 = vadd.f32 %v965_v52, %v886_v48  ;;  %v967_v56 = vpop.f32.mrb[11].mxu0 }
 0x526   :  { %v986_v26 = vand.u32 2147483647, %v978_v20  ;;  %v968_v28 = vadd.f32 %v967_v56, %v890_v16 }
 0x527   :  { %1065 = vst [vmem:[#allocation13 + $0x8] sm:$0xff] %v966_v55 }
 0x528   :  { %v988_v59 = vsub.f32 0.0, %v986_v26  ;;  %v979_v60 = vsub.f32 %v1925_v51, %v968_v28 }
 0x529   :  { %1620 = shalt.err (!%p1617_p10)
}
 0x52a   :  { %s1621_s15 = scalar_lea.hbm %s1977_s13, 256 }
 0x52b   :  { %p1622_p11 = scmp.ne.s32.totalorder %s1977_s13, %s1621_s15  ;;  %p1625_p12 = scmp.lt.u32.totalorder %s1621_s15, %s1977_s13 }
 0x52d   :  { %p1627_p13 = pnand %p1625_p12, %p1622_p11 }
 0x52f   :  { %1630 = shalt.err (!%p1627_p13)
}
 0x530   :  { %1079 = dma.vmem_to_hbm [thread:$0]  %s1074_s20, 256, %s1977_s13, [#allocation4], %s1670_s5, %s1670_s5, %s1671_s28   ;;  %v990_v61 = vmul.f32 1.442695, %v988_v59  ;;  %v987_v62 = vand.u32 2147483647, %v979_v60  ;;  %vm982_vm2 = vcmp.ne.f32.partialorder %v978_v20, %v978_v20  ;;  %vm983_vm4 = vcmp.ne.f32.partialorder %v979_v60, %v979_v60 }
 0x531   :  { %v980_v15 = vmax.f32 %v978_v20, 0.0  ;;  %v981_v23 = vmax.f32 %v979_v60, 0.0  ;;  %v1123_v24 = vld [vmem:[%s1975_s11] ss:$0 sm:$0xff]  ;;  %s1677_s11 = smov [#allocation14]  }
 0x532   :  { %1461 = vpow2.f32 %v990_v61  ;;  %v989_v63 = vsub.f32 0.0, %v987_v62  ;;  %s1085_s26 = sshll.u32 %s1677_s11, 4  ;;  %s1086_s26 = int_to_ptr.vmem [resolvable:$true] %s1085_s26 }
 0x533   :  { %s1631_s9 = scalar_lea.vmem %s1086_s26, 256  ;;  %p1636_p1 = scmp.lt.s32.totalorder %s1086_s26, %s1086_s26 }
 0x534   :  { %v992_v0 = vmul.f32 1.442695, %v989_v63  ;;  %p1632_p0 = scmp.ne.s32.totalorder %s1086_s26, %s1631_s9  ;;  %p1637_p2 = scmp.lt.s32.totalorder %s1631_s9, %s1631_s9 }
 0x536   :  { %1463 = vpow2.f32 %v992_v0  ;;  %p1638_p3 = por %p1637_p2, %p1636_p1 }
 0x538   :  { %p1639_p4 = pnand %p1638_p3, %p1632_p0 }
 0x53c   :  { %v1462_v1 = vpop.eup %1461 }
 0x53d   :  { %v994_v2 = vadd.f32 1.0, %v1462_v1  ;;  %v997_v7 = vmul.f32 -0.5, %v1462_v1  ;;  %v1000_v54 = vand.u32 2147483647, %v1462_v1 }
 0x53f   :  { %1465 = vlog2.f32 %v994_v2  ;;  %v998_v53 = vadd.f32 1.0, %v997_v7  ;;  %vm1001_vm1 = vcmp.lt.f32.partialorder %v1000_v54, 0.0004427343 }
 0x540   :  { %v1464_v4 = vpop.eup %1463 }
 0x541   :  { %v1003_v6 = vadd.f32 1.0, %v1464_v4  ;;  %v1006_v10 = vmul.f32 -0.5, %v1464_v4  ;;  %v999_v13 = vmul.f32 %v1462_v1, %v998_v53  ;;  %v1009_v57 = vand.u32 2147483647, %v1464_v4 }
 0x543   :  { %1467 = vlog2.f32 %v1003_v6  ;;  %v1007_v14 = vadd.f32 1.0, %v1006_v10  ;;  %vm1010_vm3 = vcmp.lt.f32.partialorder %v1009_v57, 0.0004427343 }
 0x545   :  { %v1008_v5 = vmul.f32 %v1464_v4, %v1007_v14 }
 0x549   :  { %v1466_v11 = vpop.eup %1465 }
 0x54a   :  { %v996_v12 = vmul.f32 0.6931472, %v1466_v11 }
 0x54c   :  { %v1002_v58 = vsel %vm1001_vm1, %v999_v13, %v996_v12 }
 0x54d   :  { %v1468_v18 = vpop.eup %1467  ;;  %v1012_v3 = vadd.f32 %v1002_v58, %v980_v15 }
 0x54e   :  { %v1005_v21 = vmul.f32 0.6931472, %v1468_v18 }
 0x54f   :  { %v1014_v22 = vsel %vm982_vm2, %v978_v20, %v1012_v3 }
 0x550   :  { %v1016_v25 = vsub.f32 %v1925_v51, %v1014_v22  ;;  %v1011_v27 = vsel %vm1010_vm3, %v1008_v5, %v1005_v21 }
 0x551   :  { %v1013_v29 = vadd.f32 %v1011_v27, %v981_v23 }
 0x552   :  { %v1024_v8 = vsub.f32 %v1016_v25, %v1123_v24 }
 0x553   :  { %v1015_v30 = vsel %vm983_vm4, %v979_v60, %v1013_v29 }
 0x554   :  { %v1017_v9 = vsub.f32 %v1925_v51, %v1015_v30  ;;  %v1032_v31 = vand.u32 2147483647, %v1024_v8  ;;  %v1026_v49 = vmax.f32 %v1024_v8, 0.0  ;;  %vm1028_vm6 = vcmp.ne.f32.partialorder %v1024_v8, %v1024_v8 }
 0x556   :  { %v1025_v32 = vsub.f32 %v1017_v9, %v1123_v24  ;;  %v1034_v33 = vsub.f32 0.0, %v1032_v31 }
 0x558   :  { %v1033_v34 = vand.u32 2147483647, %v1025_v32  ;;  %v1036_v35 = vmul.f32 1.442695, %v1034_v33  ;;  %v1027_v55 = vmax.f32 %v1025_v32, 0.0  ;;  %vm1029_vm8 = vcmp.ne.f32.partialorder %v1025_v32, %v1025_v32 }
 0x55a   :  { %v1035_v36 = vsub.f32 0.0, %v1033_v34  ;;  %1469 = vpow2.f32 %v1036_v35 }
 0x55c   :  { %v1038_v37 = vmul.f32 1.442695, %v1035_v36 }
 0x55e   :  { %1471 = vpow2.f32 %v1038_v37 }
 0x564   :  { %v1470_v38 = vpop.eup %1469 }
 0x565   :  { %v1040_v39 = vadd.f32 1.0, %v1470_v38  ;;  %v1043_v42 = vmul.f32 -0.5, %v1470_v38  ;;  %v1046_v45 = vand.u32 2147483647, %v1470_v38 }
 0x567   :  { %1473 = vlog2.f32 %v1040_v39  ;;  %v1044_v43 = vadd.f32 1.0, %v1043_v42  ;;  %vm1047_vm5 = vcmp.lt.f32.partialorder %v1046_v45, 0.0004427343 }
 0x568   :  { %v1472_v40 = vpop.eup %1471 }
 0x569   :  { %v1049_v41 = vadd.f32 1.0, %v1472_v40  ;;  %v1052_v44 = vmul.f32 -0.5, %v1472_v40  ;;  %v1045_v48 = vmul.f32 %v1470_v38, %v1044_v43  ;;  %v1055_v17 = vand.u32 2147483647, %v1472_v40 }
 0x56b   :  { %1475 = vlog2.f32 %v1049_v41  ;;  %v1053_v16 = vadd.f32 1.0, %v1052_v44  ;;  %vm1056_vm7 = vcmp.lt.f32.partialorder %v1055_v17, 0.0004427343 }
 0x56d   :  { %v1054_v52 = vmul.f32 %v1472_v40, %v1053_v16 }
 0x571   :  { %v1474_v46 = vpop.eup %1473 }
 0x572   :  { %v1042_v47 = vmul.f32 0.6931472, %v1474_v46 }
 0x574   :  { %v1048_v50 = vsel %vm1047_vm5, %v1045_v48, %v1042_v47 }
 0x575   :  { %v1476_v51 = vpop.eup %1475  ;;  %v1058_v19 = vadd.f32 %v1048_v50, %v1026_v49 }
 0x576   :  { %v1051_v20 = vmul.f32 0.6931472, %v1476_v51 }
 0x577   :  { %v1060_v56 = vsel %vm1028_vm6, %v1024_v8, %v1058_v19 }
 0x578   :  { %v1057_v26 = vsel %vm1056_vm7, %v1054_v52, %v1051_v20  ;;  %v1062_v28 = vadd.f32 %v1123_v24, %v1060_v56 }
 0x579   :  { %v1059_v59 = vadd.f32 %v1057_v26, %v1027_v55 }
 0x57a   :  { %1066 = vst [vmem:[#allocation14] sm:$0xff] %v1062_v28 }
 0x57b   :  { %v1061_v60 = vsel %vm1029_vm8, %v1025_v32, %v1059_v59 }
 0x57c   :  { %v1063_v61 = vadd.f32 %v1123_v24, %v1061_v60 }
 0x57e   :  { %1067 = vst [vmem:[#allocation14 + $0x8] sm:$0xff] %v1063_v61 }
 0x57f   :  { %1642 = shalt.err (!%p1639_p4)
}
 0x580   :  { %s1643_s24 = scalar_lea.hbm %s1978_s14, 256 }
 0x581   :  { %p1644_p5 = scmp.ne.s32.totalorder %s1978_s14, %s1643_s24  ;;  %p1647_p6 = scmp.lt.u32.totalorder %s1643_s24, %s1978_s14 }
 0x583   :  { %p1649_p7 = pnand %p1647_p6, %p1644_p5 }
 0x585   :  { %1652 = shalt.err (!%p1649_p7)
}
 0x586   :  { %1091 = dma.vmem_to_hbm [thread:$0]  %s1086_s26, 256, %s1978_s14, [#allocation15], %s1670_s5, %s1670_s5, %s1671_s28  }
 0x587   :  { %1661 = dma.done.wait [#allocation4], 256  }
 0x588   :  { %1662 = vsyncadd [#allocation4], 4294967040 }
 0x589   :  { %1663 = dma.done.wait [#allocation15], 256  }
 0x58a   :  { %1664 = vsyncadd [#allocation15], 4294967040 }
 0x58b   :  { %1098 = vsyncpa [#allocation3], 1 }
 0x58c   :  { %1099 = vsyncpa [#allocation6], 1 }
 0x58d   :  { %1100 = vsyncpa [#allocation9], 1 }
 0x58e   :  { %1101 = vsyncpa [#allocation12], 1 }
 0x58f   :  { %1102 = vsyncpa [#allocation4], 1 }
 0x590   :  { %1103 = vsyncpa [#allocation15], 1 }

</bundles_post_ra>
